<compile_context>
chip_gen: v5e
topology: v5e:2x2
jax: 0.10.0
libtpu: 0.0.40
codegen_flags: <defaults>
</compile_context>

<pallas_src>
import jax
import jax.numpy as jnp
from jax import lax
from jax.experimental import pallas as pl
from jax.experimental.pallas import tpu as pltpu
import numpy as np

# ----------------------------- config -----------------------------
INPUT_CHANNELS = 4
WINDOW_SIZE = 16
CHANNELS = [8, 16]          # cfg.channels
KERNEL_SIZE = 3             # cfg.kernel_size
MAX_POOL = 2                # cfg.max_pool_size
HIDDEN_SIZES = [32, 8]      # cfg.hidden_sizes
LATENT_SIGMOID = True
BN_EPS = 1e-5

CONV_OUT = WINDOW_SIZE // (MAX_POOL ** len(CHANNELS))   # 4
C_LAST = CHANNELS[-1]                                   # 16
FLAT = WINDOW_SIZE * INPUT_CHANNELS                     # 64 (per-sample I/O width)
STATE = 64                                              # uniform padded width of every layer
N_LAYERS = 8                                            # matmuls after pool-phase fusion


def _round_up(n, m):
    return ((n + m - 1) // m) * m


def pick_group():
    """Samples packed per matmul row: 2 -> 128-wide contractions (v5e 128x128 MXU),
    4 -> 256-wide (v6e/v7x 256x256 MXU)."""
    try:
        kind = jax.devices()[0].device_kind.lower()
    except Exception:
        return 2
    if any(v in kind for v in ("v2", "v3", "v4", "v5")):
        return 2
    return 4


# --------------------------- the kernel ---------------------------
def _ae_kernel(x_ref, w_ref, b_ref, out_ref):
    gs = x_ref.shape[1]                                  # G*64 (128 or 256), lane-dense
    bias = b_ref[...]                                    # (8, gs)

    def mm(h, k):                                        # plain layer: (rt, gs) @ (gs, gs)
        return jnp.dot(h, w_ref[k, :, :gs], preferred_element_type=jnp.float32)

    def mm2(h, k):                                       # pool-phase fused: (rt, gs) @ (gs, 2*gs)
        return jnp.dot(h, w_ref[k], preferred_element_type=jnp.float32)

    def brow(k):
        return bias[k:k + 1, :]                          # (1, gs), broadcasts over batch rows

    h = x_ref[...]                                       # (rt, gs), per-sample (l, c) order

    # encoder: [Conv1d + BN + ReLU + MaxPool] x 2, each = ONE matmul + max of the two halves
    y = mm2(h, 0)
    h = jnp.maximum(jnp.maximum(y[:, :gs], y[:, gs:]) + brow(0), 0.0)   # per sample: 8*8
    y = mm2(h, 1)
    h = jnp.maximum(jnp.maximum(y[:, :gs], y[:, gs:]) + brow(1), 0.0)   # per sample: 4*16

    # encoder MLP head (Flatten permutation folded into W[2]); padding cols stay exactly 0
    h = jnp.maximum(mm(h, 2) + brow(2), 0.0)
    z = mm(h, 3) + brow(3)
    lat = 1.0 / (1.0 + jnp.exp(-z))          # padded latent cols hold sigmoid(0)=0.5 (sliced away)

    # decoder MLP (Unflatten (c,l)->(l,c) permutation folded into W[5]); padding cancels out
    d = jnp.maximum(mm(lat, 4) + brow(4), 0.0)
    d = jnp.maximum(mm(d, 5) + brow(5), 0.0)
    # decoder: Upsample + ConvTranspose1d (+ BN + ReLU), each fused to one matmul
    d = jnp.maximum(mm(d, 6) + brow(6), 0.0)
    rec = mm(d, 7) + brow(7)                             # per sample: 16*4 in (l, c) order

    # single merged, lane-dense output slab: [reconstruction | latent]
    out_ref[:, :gs] = rec
    out_ref[:, gs:] = lat


# --------------------------- wrapper ------------------------------
def convolutional_ae_forward(x, w_slab, b_slab, *, b_tile=1024):
    B = x.shape[0]
    assert x.shape[1:] == (WINDOW_SIZE, INPUT_CHANNELS)
    group = w_slab.shape[1] // STATE
    gs = group * STATE

    xf = x.reshape(B, FLAT).astype(jnp.float32)          # row-major == (l, c) flatten order
    rows = -(-B // group)                                # packed rows (group samples per row)
    if rows * group != B:
        xf = jnp.pad(xf, ((0, rows * group - B), (0, 0)))
    xp = xf.reshape(rows, gs)

    # Row-tile: big enough to amortize per-step overhead, but keep >=2 grid blocks so the
    # "parallel" axis can be sharded across v7x's two TensorCores.
    rt = max(8, _round_up(b_tile, 8 * group) // group)
    rt = min(rt, _round_up(rows, 8))
    if rows > 8:
        rt = min(rt, _round_up(-(-rows // 2), 8))
    rt = max(rt, 8)
    rp = _round_up(rows, rt)
    if rp != rows:
        xp = jnp.pad(xp, ((0, rp - rows), (0, 0)))

    out = pl.pallas_call(
        _ae_kernel,
        grid=(rp // rt,),
        in_specs=[pl.BlockSpec((rt, gs), lambda i: (i, 0)),
                  # constant index_map -> parameter slabs DMA'd once, resident across steps
                  pl.BlockSpec(w_slab.shape, lambda i: (0, 0, 0)),
                  pl.BlockSpec(b_slab.shape, lambda i: (0, 0))],
        out_specs=pl.BlockSpec((rt, 2 * gs), lambda i: (i, 0)),
        out_shape=jax.ShapeDtypeStruct((rp, 2 * gs), jnp.float32),
        compiler_params=pltpu.CompilerParams(dimension_semantics=("parallel",)),
    )(xp, w_slab, b_slab)

    rec = out[:, :gs].reshape(rp * group, STATE)[:B]
    lat = out[:, gs:].reshape(rp * group, STATE)[:B, :HIDDEN_SIZES[-1]]
    return rec.reshape(B, WINDOW_SIZE, INPUT_CHANNELS), lat


# ------------------ host-side parameter lowering -------------------
def _bn_fold(g, b, rm, rv):
    s = g / np.sqrt(rv + BN_EPS)
    t = b - rm * s
    return s, t


def _conv_toeplitz(w_oik, L):
    """Conv1d cross-correlation ('same' zero pad, stride 1) as a dense matrix acting on a row
    vector flattened in (position, channel) order: flat_out = flat_in @ M."""
    Cout, Cin, K = w_oik.shape
    pad = K // 2
    M = np.zeros((L * Cin, L * Cout), np.float32)
    for lo in range(L):
        for k in range(K):
            li = lo + k - pad
            if 0 <= li < L:
                M[li * Cin:(li + 1) * Cin, lo * Cout:(lo + 1) * Cout] += w_oik[:, :, k].T
    return M


def _convT_as_conv(w_iok):
    """ConvTranspose1d weight (Cin, Cout, K), stride=1, padding=K//2 == Conv1d with flipped
    kernel; returns the equivalent Conv1d weight (Cout, Cin, K)."""
    return np.ascontiguousarray(np.transpose(w_iok[:, :, ::-1], (1, 0, 2)))


def _upsample_matrix(L_in, C, p):
    """nn.Upsample(scale_factor=p, mode='nearest') on (position, channel)-flattened rows."""
    U = np.zeros((L_in * C, L_in * p * C), np.float32)
    eye = np.eye(C, dtype=np.float32)
    for lu in range(L_in * p):
        li = lu // p
        U[li * C:(li + 1) * C, lu * C:(lu + 1) * C] = eye
    return U


def _pool_split(M, bias_col, L, Cout, p):
    """Fold MaxPool1d(p, p) into a (BN-folded) Toeplitz matrix by splitting output columns
    into the p pooling phases: maxpool(relu(y)) == relu(max_j(x @ W_j) + bias)."""
    rows = M.shape[0]
    M4 = M.reshape(rows, L // p, p, Cout)
    mats = [np.ascontiguousarray(M4[:, :, j, :].reshape(rows, (L // p) * Cout))
            for j in range(p)]
    b = bias_col.reshape(L // p, p, Cout)[:, 0, :].reshape(-1)   # identical across phases
    return mats, b


def _pad_to(a, shape):
    out = np.zeros(shape, np.float32)
    out[tuple(slice(0, s) for s in a.shape)] = a
    return out


def build_kernel_params(pt, *, group=2):
    """Lower PyTorch-convention params to 2 packed slabs:
    W (8, group*64, 2*group*64) and B (8, group*64), with `group` samples block-diag packed."""
    npf = lambda a: np.asarray(a, np.float32)
    c0, c1, c2 = INPUT_CHANNELS, CHANNELS[0], CHANNELS[1]
    L0, L1, L2 = WINDOW_SIZE, WINDOW_SIZE // MAX_POOL, CONV_OUT     # 16, 8, 4
    h0, h1 = HIDDEN_SIZES
    F = CONV_OUT * C_LAST                                           # 64
    gs = group * STATE

    eye_g = np.eye(group, dtype=np.float32)

    def bd(m):                                  # per-sample (<=64,<=64) -> block-diag (gs, gs)
        return np.kron(eye_g, _pad_to(m, (STATE, STATE)))

    def bvec(b):                                # per-sample (<=64,) -> tiled (gs,)
        return np.tile(_pad_to(b, (STATE,)), group)

    Ws = np.zeros((N_LAYERS, gs, 2 * gs), np.float32)
    Bs = np.zeros((N_LAYERS, gs), np.float32)

    # encoder block 1: Conv1d(c0->c1) + BN1 + ReLU + MaxPool (pool phases packed along N)
    s1, t1 = _bn_fold(npf(pt["bn1_g"]), npf(pt["bn1_b"]), npf(pt["bn1_rm"]), npf(pt["bn1_rv"]))
    M1 = _conv_toeplitz(npf(pt["conv1_w"]), L0) * np.tile(s1, L0)[None, :]
    bias1 = np.tile(npf(pt["conv1_b"]) * s1 + t1, L0)
    (m1a, m1b), be1 = _pool_split(M1, bias1, L0, c1, MAX_POOL)
    Ws[0, :, :gs], Ws[0, :, gs:], Bs[0] = bd(m1a), bd(m1b), bvec(be1)

    # encoder block 2: Conv1d(c1->c2) + BN2 + ReLU + MaxPool
    s2, t2 = _bn_fold(npf(pt["bn2_g"]), npf(pt["bn2_b"]), npf(pt["bn2_rm"]), npf(pt["bn2_rv"]))
    M2 = _conv_toeplitz(npf(pt["conv2_w"]), L1) * np.tile(s2, L1)[None, :]
    bias2 = np.tile(npf(pt["conv2_b"]) * s2 + t2, L1)
    (m2a, m2b), be2 = _pool_split(M2, bias2, L1, c2, MAX_POOL)
    Ws[1, :, :gs], Ws[1, :, gs:], Bs[1] = bd(m2a), bd(m2b), bvec(be2)

    # encoder MLP: torch Flatten is (c, l)-ordered; permute lin1 columns to our (l, c) order
    wl1 = np.transpose(npf(pt["lin1_w"]).reshape(h0, c2, L2), (2, 1, 0)).reshape(F, h0)
    Ws[2, :, :gs], Bs[2] = bd(wl1), bvec(npf(pt["lin1_b"]))
    Ws[3, :, :gs], Bs[3] = bd(npf(pt["lin2_w"]).T), bvec(npf(pt["lin2_b"]))

    # decoder MLP; torch Unflatten target (c, l) is permuted back into (l, c) via dlin2 rows
    Ws[4, :, :gs], Bs[4] = bd(npf(pt["dlin1_w"]).T), bvec(npf(pt["dlin1_b"]))
    wd2 = np.transpose(npf(pt["dlin2_w"]).reshape(c2, L2, h0), (1, 0, 2)).reshape(F, h0).T
    Ws[5, :, :gs] = bd(wd2)
    Bs[5] = bvec(npf(pt["dlin2_b"]).reshape(c2, L2).T.reshape(-1))

    # decoder conv block 1: Upsample + ConvTranspose1d(c2->c1) + BN3 + ReLU, fused to one matrix
    s3, t3 = _bn_fold(npf(pt["bn3_g"]), npf(pt["bn3_b"]), npf(pt["bn3_rm"]), npf(pt["bn3_rv"]))
    T1 = _conv_toeplitz(_convT_as_conv(npf(pt["dct1_w"])), L1)      # (L1*c2, L1*c1) = (128, 64)
    U1 = _upsample_matrix(L2, c2, MAX_POOL)                         # (64, 128)
    Ws[6, :, :gs] = bd((U1 @ T1) * np.tile(s3, L1)[None, :])
    Bs[6] = bvec(np.tile(npf(pt["dct1_b"]) * s3 + t3, L1))

    # decoder conv block 2: Upsample + ConvTranspose1d(c1->c0), no BN/ReLU
    T2 = _conv_toeplitz(_convT_as_conv(npf(pt["dct2_w"])), L0)      # (L0*c1, L0*c0) = (128, 64)
    U2 = _upsample_matrix(L1, c1, MAX_POOL)                         # (64, 128)
    Ws[7, :, :gs] = bd(U2 @ T2)
    Bs[7] = bvec(np.tile(npf(pt["dct2_b"]), L0))

    return jnp.asarray(Ws), jnp.asarray(Bs)


# ----------------- deterministic parameter init --------------------
def init_params(key):
    ks = iter(jax.random.split(key, 40))

    def rn(shape, scale=0.1):
        return scale * jax.random.normal(next(ks), shape, dtype=jnp.float32)

    c0, c1, c2 = INPUT_CHANNELS, CHANNELS[0], CHANNELS[1]
    K = KERNEL_SIZE
    h0, h1 = HIDDEN_SIZES
    f = CONV_OUT * C_LAST

    pt = {}
    pt["conv1_w"] = rn((c1, c0, K)); pt["conv1_b"] = rn((c1,))
    pt["bn1_g"] = 1.0 + rn((c1,)); pt["bn1_b"] = rn((c1,))
    pt["bn1_rm"] = rn((c1,)); pt["bn1_rv"] = 1.0 + 0.1 * jax.random.uniform(next(ks), (c1,), dtype=jnp.float32)
    pt["conv2_w"] = rn((c2, c1, K)); pt["conv2_b"] = rn((c2,))
    pt["bn2_g"] = 1.0 + rn((c2,)); pt["bn2_b"] = rn((c2,))
    pt["bn2_rm"] = rn((c2,)); pt["bn2_rv"] = 1.0 + 0.1 * jax.random.uniform(next(ks), (c2,), dtype=jnp.float32)
    pt["lin1_w"] = rn((h0, f)); pt["lin1_b"] = rn((h0,))
    pt["lin2_w"] = rn((h1, h0)); pt["lin2_b"] = rn((h1,))
    pt["dlin1_w"] = rn((h0, h1)); pt["dlin1_b"] = rn((h0,))
    pt["dlin2_w"] = rn((f, h0)); pt["dlin2_b"] = rn((f,))
    pt["dct1_w"] = rn((c2, c1, K)); pt["dct1_b"] = rn((c1,))   # ConvTranspose1d weight: (in, out, K)
    pt["bn3_g"] = 1.0 + rn((c1,)); pt["bn3_b"] = rn((c1,))
    pt["bn3_rm"] = rn((c1,)); pt["bn3_rv"] = 1.0 + 0.1 * jax.random.uniform(next(ks), (c1,), dtype=jnp.float32)
    pt["dct2_w"] = rn((c1, c0, K)); pt["dct2_b"] = rn((c0,))
    return pt


# ------------------ pure-JAX reference (NCW, like torch) ------------------
def reference_forward(x, pt):
    hp = lax.Precision.HIGHEST
    h = jnp.transpose(x, (0, 2, 1))                       # (B, Cin, L)

    def conv1d(h, w, b):
        y = lax.conv_general_dilated(h, w, window_strides=(1,),
                                     padding=((KERNEL_SIZE // 2, KERNEL_SIZE // 2),),
                                     dimension_numbers=("NCH", "OIH", "NCH"),
                                     precision=hp)
        return y + b[None, :, None]

    def bn(h, g, be, rm, rv):
        return (h - rm[None, :, None]) / jnp.sqrt(rv[None, :, None] + BN_EPS) * g[None, :, None] + be[None, :, None]

    def maxpool(h):
        B, C, L = h.shape
        return h.reshape(B, C, L // MAX_POOL, MAX_POOL).max(axis=-1)

    def upsample(h):
        return jnp.repeat(h, MAX_POOL, axis=2)

    def convT1d(h, w, b):
        wflip = jnp.transpose(jnp.flip(w, axis=2), (1, 0, 2))   # (Cout, Cin, K)
        return conv1d(h, wflip, b)

    # encoder
    h = maxpool(jnp.maximum(bn(conv1d(h, pt["conv1_w"], pt["conv1_b"]),
                               pt["bn1_g"], pt["bn1_b"], pt["bn1_rm"], pt["bn1_rv"]), 0.0))
    h = maxpool(jnp.maximum(bn(conv1d(h, pt["conv2_w"], pt["conv2_b"]),
                               pt["bn2_g"], pt["bn2_b"], pt["bn2_rm"], pt["bn2_rv"]), 0.0))
    B = h.shape[0]
    flat = h.reshape(B, -1)
    z = jnp.dot(flat, pt["lin1_w"].T, precision=hp) + pt["lin1_b"]
    z = jnp.maximum(z, 0.0)
    z = jnp.dot(z, pt["lin2_w"].T, precision=hp) + pt["lin2_b"]
    latent = jax.nn.sigmoid(z)

    # decoder
    d = jnp.maximum(jnp.dot(latent, pt["dlin1_w"].T, precision=hp) + pt["dlin1_b"], 0.0)
    d = jnp.maximum(jnp.dot(d, pt["dlin2_w"].T, precision=hp) + pt["dlin2_b"], 0.0)
    g = d.reshape(B, C_LAST, CONV_OUT)
    g = upsample(g)
    g = jnp.maximum(bn(convT1d(g, pt["dct1_w"], pt["dct1_b"]),
                       pt["bn3_g"], pt["bn3_b"], pt["bn3_rm"], pt["bn3_rv"]), 0.0)
    g = upsample(g)
    g = convT1d(g, pt["dct2_w"], pt["dct2_b"])
    return jnp.transpose(g, (0, 2, 1)), latent


if __name__ == "__main__":
    key = jax.random.PRNGKey(0)
    kx, kp_key = jax.random.split(key)

    pt = init_params(kp_key)
    group = pick_group()                       # 2 on v5e (128-wide), 4 on v6e/v7x (256-wide)
    w_slab, b_slab = build_kernel_params(pt, group=group)

    # small shape consistent with the module: batch=2, window=16, channels=4
    x = jax.random.normal(kx, (2, WINDOW_SIZE, INPUT_CHANNELS), dtype=jnp.float32)
    out, latent = convolutional_ae_forward(x, w_slab, b_slab)
    out = jax.block_until_ready(out)
    latent = jax.block_until_ready(latent)
    assert out.shape == (2, WINDOW_SIZE, INPUT_CHANNELS)
    assert latent.shape == (2, HIDDEN_SIZES[-1])

    ref_out, ref_lat = reference_forward(x, pt)
    np.testing.assert_allclose(np.asarray(out), np.asarray(ref_out), atol=5e-4, rtol=5e-4)
    np.testing.assert_allclose(np.asarray(latent), np.asarray(ref_lat), atol=5e-4, rtol=5e-4)

    # larger, non-divisible batch exercises packing padding + the multi-block "parallel" path
    xb = jax.random.normal(jax.random.PRNGKey(1), (515, WINDOW_SIZE, INPUT_CHANNELS), dtype=jnp.float32)
    out_b, lat_b = convolutional_ae_forward(xb, w_slab, b_slab, b_tile=1024)
    out_b = jax.block_until_ready(out_b)
    lat_b = jax.block_until_ready(lat_b)
    ref_out_b, ref_lat_b = reference_forward(xb, pt)
    np.testing.assert_allclose(np.asarray(out_b), np.asarray(ref_out_b), atol=5e-4, rtol=5e-4)
    np.testing.assert_allclose(np.asarray(lat_b), np.asarray(ref_lat_b), atol=5e-4, rtol=5e-4)

    print("KERNEL_OK")
</pallas_src>

<mosaic_0001>
module attributes {stable_mosaic.version = 11 : i64} {
  func.func @_ae_kernel(%arg0: i32, %arg1: memref<8x256xf32, #tpu.memory_space<vmem>>, %arg2: memref<8x256x512xf32, #tpu.memory_space<vmem>>, %arg3: memref<8x256xf32, #tpu.memory_space<vmem>>, %arg4: memref<8x512xf32, #tpu.memory_space<vmem>>) attributes {dimension_semantics = [#tpu.dimension_semantics<parallel>], iteration_bounds = array<i64: 1>, scalar_prefetch = 0 : i64, scratch_operands = 0 : i64, tpu.core_type = #tpu.core_type<tc>, window_params = [{transform_indices = @transform_0, window_bounds = array<i64: 8, 256>}, {pipeline_mode = #tpu.pipeline_mode<synchronous>, transform_indices = @transform_1, window_bounds = array<i64: 8, 256, 512>}, {pipeline_mode = #tpu.pipeline_mode<synchronous>, transform_indices = @transform_2, window_bounds = array<i64: 8, 256>}, {transform_indices = @transform_3, window_bounds = array<i64: 8, 512>}]} {
    %c0 = arith.constant 0 : index
    %c0_0 = arith.constant 0 : index
    %0 = vector.load %arg3[%c0, %c0_0] : memref<8x256xf32, #tpu.memory_space<vmem>>, vector<8x256xf32>
    %c0_1 = arith.constant 0 : index
    %c0_2 = arith.constant 0 : index
    %1 = vector.load %arg1[%c0_1, %c0_2] : memref<8x256xf32, #tpu.memory_space<vmem>>, vector<8x256xf32>
    %c0_3 = arith.constant 0 : index
    %c0_4 = arith.constant 0 : index
    %c0_5 = arith.constant 0 : index
    %2 = vector.load %arg2[%c0_3, %c0_4, %c0_5] : memref<8x256x512xf32, #tpu.memory_space<vmem>>, vector<1x256x512xf32>
    %3 = vector.shape_cast %2 : vector<1x256x512xf32> to vector<256x512xf32>
    %cst = arith.constant dense<0.000000e+00> : vector<8x512xf32>
    %4 = tpu.matmul %1, %3, %cst {dimension_numbers = #tpu.dot_dimension_numbers<[1], [0], [0], [1], [0, 0, 1, 1], [], []>} : vector<8x256xf32>, vector<256x512xf32>, vector<8x512xf32> -> vector<8x512xf32>
    %5 = vector.extract_strided_slice %4 {offsets = [0, 0], sizes = [8, 256], strides = [1, 1]} : vector<8x512xf32> to vector<8x256xf32>
    %6 = vector.extract_strided_slice %4 {offsets = [0, 256], sizes = [8, 256], strides = [1, 1]} : vector<8x512xf32> to vector<8x256xf32>
    %7 = arith.maximumf %5, %6 : vector<8x256xf32>
    %8 = vector.extract_strided_slice %0 {offsets = [0, 0], sizes = [1, 256], strides = [1, 1]} : vector<8x256xf32> to vector<1x256xf32>
    %9 = vector.broadcast %8 : vector<1x256xf32> to vector<8x256xf32>
    %10 = arith.addf %7, %9 : vector<8x256xf32>
    %cst_6 = arith.constant 0.000000e+00 : f32
    %11 = vector.broadcast %cst_6 : f32 to vector<8x256xf32>
    %12 = arith.maximumf %10, %11 : vector<8x256xf32>
    %c1 = arith.constant 1 : index
    %c0_7 = arith.constant 0 : index
    %c0_8 = arith.constant 0 : index
    %13 = vector.load %arg2[%c1, %c0_7, %c0_8] : memref<8x256x512xf32, #tpu.memory_space<vmem>>, vector<1x256x512xf32>
    %14 = vector.shape_cast %13 : vector<1x256x512xf32> to vector<256x512xf32>
    %cst_9 = arith.constant dense<0.000000e+00> : vector<8x512xf32>
    %15 = tpu.matmul %12, %14, %cst_9 {dimension_numbers = #tpu.dot_dimension_numbers<[1], [0], [0], [1], [0, 0, 1, 1], [], []>} : vector<8x256xf32>, vector<256x512xf32>, vector<8x512xf32> -> vector<8x512xf32>
    %16 = vector.extract_strided_slice %15 {offsets = [0, 0], sizes = [8, 256], strides = [1, 1]} : vector<8x512xf32> to vector<8x256xf32>
    %17 = vector.extract_strided_slice %15 {offsets = [0, 256], sizes = [8, 256], strides = [1, 1]} : vector<8x512xf32> to vector<8x256xf32>
    %18 = arith.maximumf %16, %17 : vector<8x256xf32>
    %19 = vector.extract_strided_slice %0 {offsets = [1, 0], sizes = [1, 256], strides = [1, 1]} : vector<8x256xf32> to vector<1x256xf32>
    %20 = vector.broadcast %19 : vector<1x256xf32> to vector<8x256xf32>
    %21 = arith.addf %18, %20 : vector<8x256xf32>
    %cst_10 = arith.constant 0.000000e+00 : f32
    %22 = vector.broadcast %cst_10 : f32 to vector<8x256xf32>
    %23 = arith.maximumf %21, %22 : vector<8x256xf32>
    %c2 = arith.constant 2 : index
    %c0_11 = arith.constant 0 : index
    %c0_12 = arith.constant 0 : index
    %24 = vector.load %arg2[%c2, %c0_11, %c0_12] : memref<8x256x512xf32, #tpu.memory_space<vmem>>, vector<1x256x256xf32>
    %25 = vector.shape_cast %24 : vector<1x256x256xf32> to vector<256x256xf32>
    %cst_13 = arith.constant dense<0.000000e+00> : vector<8x256xf32>
    %26 = tpu.matmul %23, %25, %cst_13 {dimension_numbers = #tpu.dot_dimension_numbers<[1], [0], [0], [1], [0, 0, 1, 1], [], []>} : vector<8x256xf32>, vector<256x256xf32>, vector<8x256xf32> -> vector<8x256xf32>
    %27 = vector.extract_strided_slice %0 {offsets = [2, 0], sizes = [1, 256], strides = [1, 1]} : vector<8x256xf32> to vector<1x256xf32>
    %28 = vector.broadcast %27 : vector<1x256xf32> to vector<8x256xf32>
    %29 = arith.addf %26, %28 : vector<8x256xf32>
    %cst_14 = arith.constant 0.000000e+00 : f32
    %30 = vector.broadcast %cst_14 : f32 to vector<8x256xf32>
    %31 = arith.maximumf %29, %30 : vector<8x256xf32>
    %c3 = arith.constant 3 : index
    %c0_15 = arith.constant 0 : index
    %c0_16 = arith.constant 0 : index
    %32 = vector.load %arg2[%c3, %c0_15, %c0_16] : memref<8x256x512xf32, #tpu.memory_space<vmem>>, vector<1x256x256xf32>
    %33 = vector.shape_cast %32 : vector<1x256x256xf32> to vector<256x256xf32>
    %cst_17 = arith.constant dense<0.000000e+00> : vector<8x256xf32>
    %34 = tpu.matmul %31, %33, %cst_17 {dimension_numbers = #tpu.dot_dimension_numbers<[1], [0], [0], [1], [0, 0, 1, 1], [], []>} : vector<8x256xf32>, vector<256x256xf32>, vector<8x256xf32> -> vector<8x256xf32>
    %35 = vector.extract_strided_slice %0 {offsets = [3, 0], sizes = [1, 256], strides = [1, 1]} : vector<8x256xf32> to vector<1x256xf32>
    %36 = vector.broadcast %35 : vector<1x256xf32> to vector<8x256xf32>
    %37 = arith.addf %34, %36 : vector<8x256xf32>
    %cst_18 = arith.constant 0.000000e+00 : f32
    %38 = vector.broadcast %cst_18 : f32 to vector<8x256xf32>
    %39 = arith.subf %38, %37 : vector<8x256xf32>
    %40 = math.exp %39 : vector<8x256xf32>
    %cst_19 = arith.constant 1.000000e+00 : f32
    %41 = vector.broadcast %cst_19 : f32 to vector<8x256xf32>
    %42 = arith.addf %41, %40 : vector<8x256xf32>
    %cst_20 = arith.constant 1.000000e+00 : f32
    %43 = vector.broadcast %cst_20 : f32 to vector<8x256xf32>
    %44 = arith.divf %43, %42 : vector<8x256xf32>
    %c4 = arith.constant 4 : index
    %c0_21 = arith.constant 0 : index
    %c0_22 = arith.constant 0 : index
    %45 = vector.load %arg2[%c4, %c0_21, %c0_22] : memref<8x256x512xf32, #tpu.memory_space<vmem>>, vector<1x256x256xf32>
    %46 = vector.shape_cast %45 : vector<1x256x256xf32> to vector<256x256xf32>
    %cst_23 = arith.constant dense<0.000000e+00> : vector<8x256xf32>
    %47 = tpu.matmul %44, %46, %cst_23 {dimension_numbers = #tpu.dot_dimension_numbers<[1], [0], [0], [1], [0, 0, 1, 1], [], []>} : vector<8x256xf32>, vector<256x256xf32>, vector<8x256xf32> -> vector<8x256xf32>
    %48 = vector.extract_strided_slice %0 {offsets = [4, 0], sizes = [1, 256], strides = [1, 1]} : vector<8x256xf32> to vector<1x256xf32>
    %49 = vector.broadcast %48 : vector<1x256xf32> to vector<8x256xf32>
    %50 = arith.addf %47, %49 : vector<8x256xf32>
    %cst_24 = arith.constant 0.000000e+00 : f32
    %51 = vector.broadcast %cst_24 : f32 to vector<8x256xf32>
    %52 = arith.maximumf %50, %51 : vector<8x256xf32>
    %c5 = arith.constant 5 : index
    %c0_25 = arith.constant 0 : index
    %c0_26 = arith.constant 0 : index
    %53 = vector.load %arg2[%c5, %c0_25, %c0_26] : memref<8x256x512xf32, #tpu.memory_space<vmem>>, vector<1x256x256xf32>
    %54 = vector.shape_cast %53 : vector<1x256x256xf32> to vector<256x256xf32>
    %cst_27 = arith.constant dense<0.000000e+00> : vector<8x256xf32>
    %55 = tpu.matmul %52, %54, %cst_27 {dimension_numbers = #tpu.dot_dimension_numbers<[1], [0], [0], [1], [0, 0, 1, 1], [], []>} : vector<8x256xf32>, vector<256x256xf32>, vector<8x256xf32> -> vector<8x256xf32>
    %56 = vector.extract_strided_slice %0 {offsets = [5, 0], sizes = [1, 256], strides = [1, 1]} : vector<8x256xf32> to vector<1x256xf32>
    %57 = vector.broadcast %56 : vector<1x256xf32> to vector<8x256xf32>
    %58 = arith.addf %55, %57 : vector<8x256xf32>
    %cst_28 = arith.constant 0.000000e+00 : f32
    %59 = vector.broadcast %cst_28 : f32 to vector<8x256xf32>
    %60 = arith.maximumf %58, %59 : vector<8x256xf32>
    %c6 = arith.constant 6 : index
    %c0_29 = arith.constant 0 : index
    %c0_30 = arith.constant 0 : index
    %61 = vector.load %arg2[%c6, %c0_29, %c0_30] : memref<8x256x512xf32, #tpu.memory_space<vmem>>, vector<1x256x256xf32>
    %62 = vector.shape_cast %61 : vector<1x256x256xf32> to vector<256x256xf32>
    %cst_31 = arith.constant dense<0.000000e+00> : vector<8x256xf32>
    %63 = tpu.matmul %60, %62, %cst_31 {dimension_numbers = #tpu.dot_dimension_numbers<[1], [0], [0], [1], [0, 0, 1, 1], [], []>} : vector<8x256xf32>, vector<256x256xf32>, vector<8x256xf32> -> vector<8x256xf32>
    %64 = vector.extract_strided_slice %0 {offsets = [6, 0], sizes = [1, 256], strides = [1, 1]} : vector<8x256xf32> to vector<1x256xf32>
    %65 = vector.broadcast %64 : vector<1x256xf32> to vector<8x256xf32>
    %66 = arith.addf %63, %65 : vector<8x256xf32>
    %cst_32 = arith.constant 0.000000e+00 : f32
    %67 = vector.broadcast %cst_32 : f32 to vector<8x256xf32>
    %68 = arith.maximumf %66, %67 : vector<8x256xf32>
    %c7 = arith.constant 7 : index
    %c0_33 = arith.constant 0 : index
    %c0_34 = arith.constant 0 : index
    %69 = vector.load %arg2[%c7, %c0_33, %c0_34] : memref<8x256x512xf32, #tpu.memory_space<vmem>>, vector<1x256x256xf32>
    %70 = vector.shape_cast %69 : vector<1x256x256xf32> to vector<256x256xf32>
    %cst_35 = arith.constant dense<0.000000e+00> : vector<8x256xf32>
    %71 = tpu.matmul %68, %70, %cst_35 {dimension_numbers = #tpu.dot_dimension_numbers<[1], [0], [0], [1], [0, 0, 1, 1], [], []>} : vector<8x256xf32>, vector<256x256xf32>, vector<8x256xf32> -> vector<8x256xf32>
    %72 = vector.extract_strided_slice %0 {offsets = [7, 0], sizes = [1, 256], strides = [1, 1]} : vector<8x256xf32> to vector<1x256xf32>
    %73 = vector.broadcast %72 : vector<1x256xf32> to vector<8x256xf32>
    %74 = arith.addf %71, %73 : vector<8x256xf32>
    %c0_36 = arith.constant 0 : index
    %c0_37 = arith.constant 0 : index
    %75 = vector.load %arg4[%c0_36, %c0_37] : memref<8x512xf32, #tpu.memory_space<vmem>>, vector<8x256xf32>
    tpu.vector_store %arg4[%c0_36, %c0_37], %74 {strides = array<i32>} : memref<8x512xf32, #tpu.memory_space<vmem>>, vector<8x256xf32>,
    %c0_38 = arith.constant 0 : index
    %c256 = arith.constant 256 : index
    %76 = vector.load %arg4[%c0_38, %c256] : memref<8x512xf32, #tpu.memory_space<vmem>>, vector<8x256xf32>
    tpu.vector_store %arg4[%c0_38, %c256], %44 {strides = array<i32>} : memref<8x512xf32, #tpu.memory_space<vmem>>, vector<8x256xf32>,
    return
  }
  func.func @transform_0(%arg0: i32) -> (i32, i32) {
    %c0_i32 = arith.constant 0 : i32
    %c0_i32_0 = arith.constant 0 : i32
    return %arg0, %c0_i32 : i32, i32
  }
  func.func @transform_1(%arg0: i32) -> (i32, i32, i32) {
    %c0_i32 = arith.constant 0 : i32
    %c0_i32_0 = arith.constant 0 : i32
    %c0_i32_1 = arith.constant 0 : i32
    %c0_i32_2 = arith.constant 0 : i32
    return %c0_i32, %c0_i32_0, %c0_i32_1 : i32, i32, i32
  }
  func.func @transform_2(%arg0: i32) -> (i32, i32) {
    %c0_i32 = arith.constant 0 : i32
    %c0_i32_0 = arith.constant 0 : i32
    %c0_i32_1 = arith.constant 0 : i32
    return %c0_i32, %c0_i32_0 : i32, i32
  }
  func.func @transform_3(%arg0: i32) -> (i32, i32) {
    %c0_i32 = arith.constant 0 : i32
    %c0_i32_0 = arith.constant 0 : i32
    return %arg0, %c0_i32 : i32, i32
  }
}

</mosaic_0001>

<bundles_post_ra>
// kernel: tpu_custom_call.1
= control target key start
LH: loop header
LB: loop body
LE: loop exit
PB: predicated region body
PF: predicated region fallthrough
CT: control target
= control target key end

     0   :  { %8 = vsyncpa [#allocation3], 0  ;;  %s1785_s0 = inlined_call_operand.hbm [shape: f32[8,256], index: 0, kind: input, shape index: {}]   ;;  %s1786_s1 = inlined_call_operand.hbm [shape: f32[8,256,512], index: 1, kind: input, shape index: {}]   ;;  %s1787_s2 = inlined_call_operand.hbm [shape: f32[8,256], index: 2, kind: input, shape index: {}]   ;;  %s1788_s3 = inlined_call_operand.hbm [shape: f32[8,512], index: 3, kind: output, shape index: {}]  }
   0x1   :  { %9 = vsyncpa [#allocation6], 0  ;;  %s26_s14 = sshll.u32 %s1786_s1, 4  ;;  %s27_s14 = int_to_ptr.hbm [resolvable:$true] %s26_s14 }
   0x2   :  { %10 = vsyncpa [#allocation4], 0  ;;  %s1723_s15 = smov [#allocation5]   ;;  %s16_s19 = sshll.u32 %s1785_s0, 4  ;;  %s17_s19 = int_to_ptr.hbm [resolvable:$true] %s16_s19 }
   0x3   :  { %s28_s16 = sshll.u32 %s1723_s15, 4  ;;  %s1724_s20 = smov 512   ;;  %s29_s16 = int_to_ptr.vmem [resolvable:$true] %s28_s16 }
   0x4   :  { %s1725_s21 = smov 32   ;;  %s1726_s22 = smov [#allocation2]  }
   0x5   :  { %34 = dma.hbm_to_vmem [thread:$0]  %s27_s14, 131072, %s29_s16, [#allocation6], %s1724_s20, %s1724_s20, %s1725_s21  }
   0x6   :  { %s18_s23 = sshll.u32 %s1726_s22, 4  ;;  %s40_s26 = sshll.u32 %s1787_s2, 4  ;;  %s19_s23 = int_to_ptr.vmem [resolvable:$true] %s18_s23  ;;  %s41_s26 = int_to_ptr.hbm [resolvable:$true] %s40_s26 }
   0x7   :  { %21 = dma.hbm_to_vmem [thread:$0]  %s17_s19, 256, %s19_s23, [#allocation3]  }
   0x8   :  { %s1727_s1 = smov [#allocation7]  }
   0x9   :  { %s42_s27 = sshll.u32 %s1727_s1, 4  ;;  %s43_s27 = int_to_ptr.vmem [resolvable:$true] %s42_s27 }
   0xa   :  { %45 = dma.hbm_to_vmem [thread:$0]  %s41_s26, 256, %s43_s27, [#allocation6]  }
   0xb   :  { %1717 = dma.done.wait [#allocation3], 256  }
   0xc   :  { %1718 = vsyncadd [#allocation3], 4294967040 }
   0xd   :  { %1719 = dma.done.wait [#allocation6], 131328  }
   0xe   :  { %1720 = vsyncadd [#allocation6], 4294835968  ;;  %v122_v0 = vld [vmem:[#allocation5 + $0x1e0] sm:$0xff]  ;;  %v123_v2 = vld [vmem:[#allocation5 + $0x1e8] sm:$0xff]  ;;  %s1728_s0 = smov [#allocation8]   ;;  %s1594_s30 = sshll.u32 %s1788_s3, 4  ;;  %s1595_s30 = int_to_ptr.hbm [resolvable:$true] %s1594_s30 }
   0xf   :  { %v186_v1 = vld [vmem:[#allocation5 + $0x3e0] sm:$0xff]  ;;  %190 = vmatpush.msra.mxu0 %v122_v0  ;;  %v187_v3 = vld [vmem:[#allocation5 + $0x3e8] sm:$0xff]  ;;  %230 = vmatpush.msra.mxu2 %v123_v2  ;;  %v124_v0 = vld [vmem:[#allocation5 + $0x1f0] sm:$0xff]  ;;  %s1592_s2 = sshll.u32 %s1728_s0, 4  ;;  %s1593_s2 = int_to_ptr.vmem [resolvable:$true] %s1592_s2 }
  0x10   :  { %210 = vmatpush.msra.mxu1 %v186_v1  ;;  %v118_v4 = vld [vmem:[#allocation5 + $0x1c0] sm:$0xff]  ;;  %250 = vmatpush.msra.mxu3 %v187_v3  ;;  %v119_v6 = vld [vmem:[#allocation5 + $0x1c8] sm:$0xff]  ;;  %v188_v1 = vld [vmem:[#allocation5 + $0x3f0] sm:$0xff] }
  0x11   :  { %v182_v5 = vld [vmem:[#allocation5 + $0x3c0] sm:$0xff]  ;;  %v183_v7 = vld [vmem:[#allocation5 + $0x3c8] sm:$0xff]  ;;  %191 = vmatpush.msra.mxu0 %v118_v4  ;;  %231 = vmatpush.msra.mxu2 %v119_v6  ;;  %v125_v2 = vld [vmem:[#allocation5 + $0x1f8] sm:$0xff] }
  0x12   :  { %v114_v8 = vld [vmem:[#allocation5 + $0x1a0] sm:$0xff]  ;;  %211 = vmatpush.msra.mxu1 %v182_v5  ;;  %v115_v10 = vld [vmem:[#allocation5 + $0x1a8] sm:$0xff]  ;;  %251 = vmatpush.msra.mxu3 %v183_v7  ;;  %v189_v3 = vld [vmem:[#allocation5 + $0x3f8] sm:$0xff] }
  0x13   :  { %v178_v9 = vld [vmem:[#allocation5 + $0x3a0] sm:$0xff]  ;;  %v179_v11 = vld [vmem:[#allocation5 + $0x3a8] sm:$0xff]  ;;  %192 = vmatpush.msra.mxu0 %v114_v8  ;;  %232 = vmatpush.msra.mxu2 %v115_v10  ;;  %v120_v4 = vld [vmem:[#allocation5 + $0x1d0] sm:$0xff] }
  0x14   :  { %v110_v12 = vld [vmem:[#allocation5 + $0x180] sm:$0xff]  ;;  %212 = vmatpush.msra.mxu1 %v178_v9  ;;  %v111_v14 = vld [vmem:[#allocation5 + $0x188] sm:$0xff]  ;;  %252 = vmatpush.msra.mxu3 %v179_v11  ;;  %v184_v5 = vld [vmem:[#allocation5 + $0x3d0] sm:$0xff] }
  0x15   :  { %v174_v13 = vld [vmem:[#allocation5 + $0x380] sm:$0xff]  ;;  %v175_v15 = vld [vmem:[#allocation5 + $0x388] sm:$0xff]  ;;  %193 = vmatpush.msra.mxu0 %v110_v12  ;;  %233 = vmatpush.msra.mxu2 %v111_v14  ;;  %v121_v6 = vld [vmem:[#allocation5 + $0x1d8] sm:$0xff] }
  0x16   :  { %v106_v16 = vld [vmem:[#allocation5 + $0x160] sm:$0xff]  ;;  %213 = vmatpush.msra.mxu1 %v174_v13  ;;  %v107_v18 = vld [vmem:[#allocation5 + $0x168] sm:$0xff]  ;;  %253 = vmatpush.msra.mxu3 %v175_v15  ;;  %v185_v7 = vld [vmem:[#allocation5 + $0x3d8] sm:$0xff] }
  0x17   :  { %v170_v17 = vld [vmem:[#allocation5 + $0x360] sm:$0xff]  ;;  %v171_v19 = vld [vmem:[#allocation5 + $0x368] sm:$0xff]  ;;  %194 = vmatpush.msra.mxu0 %v106_v16  ;;  %234 = vmatpush.msra.mxu2 %v107_v18  ;;  %v116_v8 = vld [vmem:[#allocation5 + $0x1b0] sm:$0xff] }
  0x18   :  { %v102_v20 = vld [vmem:[#allocation5 + $0x140] sm:$0xff]  ;;  %214 = vmatpush.msra.mxu1 %v170_v17  ;;  %v103_v22 = vld [vmem:[#allocation5 + $0x148] sm:$0xff]  ;;  %254 = vmatpush.msra.mxu3 %v171_v19  ;;  %v180_v9 = vld [vmem:[#allocation5 + $0x3b0] sm:$0xff] }
  0x19   :  { %v166_v21 = vld [vmem:[#allocation5 + $0x340] sm:$0xff]  ;;  %v167_v23 = vld [vmem:[#allocation5 + $0x348] sm:$0xff]  ;;  %195 = vmatpush.msra.mxu0 %v102_v20  ;;  %235 = vmatpush.msra.mxu2 %v103_v22  ;;  %v117_v10 = vld [vmem:[#allocation5 + $0x1b8] sm:$0xff] }
  0x1a   :  { %v98_v24 = vld [vmem:[#allocation5 + $0x120] sm:$0xff]  ;;  %215 = vmatpush.msra.mxu1 %v166_v21  ;;  %v99_v26 = vld [vmem:[#allocation5 + $0x128] sm:$0xff]  ;;  %255 = vmatpush.msra.mxu3 %v167_v23  ;;  %v181_v11 = vld [vmem:[#allocation5 + $0x3b8] sm:$0xff] }
  0x1b   :  { %v162_v25 = vld [vmem:[#allocation5 + $0x320] sm:$0xff]  ;;  %v163_v27 = vld [vmem:[#allocation5 + $0x328] sm:$0xff]  ;;  %196 = vmatpush.msra.mxu0 %v98_v24  ;;  %236 = vmatpush.msra.mxu2 %v99_v26  ;;  %v112_v12 = vld [vmem:[#allocation5 + $0x190] sm:$0xff] }
  0x1c   :  { %v94_v28 = vld [vmem:[#allocation5 + $0x100] sm:$0xff]  ;;  %216 = vmatpush.msra.mxu1 %v162_v25  ;;  %v95_v30 = vld [vmem:[#allocation5 + $0x108] sm:$0xff]  ;;  %256 = vmatpush.msra.mxu3 %v163_v27  ;;  %v176_v13 = vld [vmem:[#allocation5 + $0x390] sm:$0xff] }
  0x1d   :  { %v158_v29 = vld [vmem:[#allocation5 + $0x300] sm:$0xff]  ;;  %v159_v31 = vld [vmem:[#allocation5 + $0x308] sm:$0xff]  ;;  %197 = vmatpush.msra.mxu0 %v94_v28  ;;  %237 = vmatpush.msra.mxu2 %v95_v30  ;;  %v113_v14 = vld [vmem:[#allocation5 + $0x198] sm:$0xff] }
  0x1e   :  { %v90_v32 = vld [vmem:[#allocation5 + $0xe0] sm:$0xff]  ;;  %217 = vmatpush.msra.mxu1 %v158_v29  ;;  %v91_v34 = vld [vmem:[#allocation5 + $0xe8] sm:$0xff]  ;;  %257 = vmatpush.msra.mxu3 %v159_v31  ;;  %v177_v15 = vld [vmem:[#allocation5 + $0x398] sm:$0xff] }
  0x1f   :  { %v154_v33 = vld [vmem:[#allocation5 + $0x2e0] sm:$0xff]  ;;  %v155_v35 = vld [vmem:[#allocation5 + $0x2e8] sm:$0xff]  ;;  %198 = vmatpush.msra.mxu0 %v90_v32  ;;  %238 = vmatpush.msra.mxu2 %v91_v34  ;;  %v108_v16 = vld [vmem:[#allocation5 + $0x170] sm:$0xff] }
  0x20   :  { %v86_v36 = vld [vmem:[#allocation5 + $0xc0] sm:$0xff]  ;;  %218 = vmatpush.msra.mxu1 %v154_v33  ;;  %v87_v38 = vld [vmem:[#allocation5 + $0xc8] sm:$0xff]  ;;  %258 = vmatpush.msra.mxu3 %v155_v35  ;;  %v172_v17 = vld [vmem:[#allocation5 + $0x370] sm:$0xff] }
  0x21   :  { %v150_v37 = vld [vmem:[#allocation5 + $0x2c0] sm:$0xff]  ;;  %v151_v39 = vld [vmem:[#allocation5 + $0x2c8] sm:$0xff]  ;;  %199 = vmatpush.msra.mxu0 %v86_v36  ;;  %239 = vmatpush.msra.mxu2 %v87_v38  ;;  %v109_v18 = vld [vmem:[#allocation5 + $0x178] sm:$0xff] }
  0x22   :  { %v82_v40 = vld [vmem:[#allocation5 + $0xa0] sm:$0xff]  ;;  %219 = vmatpush.msra.mxu1 %v150_v37  ;;  %v83_v42 = vld [vmem:[#allocation5 + $0xa8] sm:$0xff]  ;;  %259 = vmatpush.msra.mxu3 %v151_v39  ;;  %v173_v19 = vld [vmem:[#allocation5 + $0x378] sm:$0xff] }
  0x23   :  { %v146_v41 = vld [vmem:[#allocation5 + $0x2a0] sm:$0xff]  ;;  %v147_v43 = vld [vmem:[#allocation5 + $0x2a8] sm:$0xff]  ;;  %200 = vmatpush.msra.mxu0 %v82_v40  ;;  %240 = vmatpush.msra.mxu2 %v83_v42  ;;  %v104_v20 = vld [vmem:[#allocation5 + $0x150] sm:$0xff] }
  0x24   :  { %v78_v44 = vld [vmem:[#allocation5 + $0x80] sm:$0xff]  ;;  %220 = vmatpush.msra.mxu1 %v146_v41  ;;  %v79_v46 = vld [vmem:[#allocation5 + $0x88] sm:$0xff]  ;;  %260 = vmatpush.msra.mxu3 %v147_v43  ;;  %v168_v21 = vld [vmem:[#allocation5 + $0x350] sm:$0xff] }
  0x25   :  { %v142_v45 = vld [vmem:[#allocation5 + $0x280] sm:$0xff]  ;;  %v143_v47 = vld [vmem:[#allocation5 + $0x288] sm:$0xff]  ;;  %201 = vmatpush.msra.mxu0 %v78_v44  ;;  %241 = vmatpush.msra.mxu2 %v79_v46  ;;  %v105_v22 = vld [vmem:[#allocation5 + $0x158] sm:$0xff] }
  0x26   :  { %v74_v48 = vld [vmem:[#allocation5 + $0x60] sm:$0xff]  ;;  %221 = vmatpush.msra.mxu1 %v142_v45  ;;  %v75_v50 = vld [vmem:[#allocation5 + $0x68] sm:$0xff]  ;;  %261 = vmatpush.msra.mxu3 %v143_v47  ;;  %v169_v23 = vld [vmem:[#allocation5 + $0x358] sm:$0xff] }
  0x27   :  { %v138_v49 = vld [vmem:[#allocation5 + $0x260] sm:$0xff]  ;;  %v139_v51 = vld [vmem:[#allocation5 + $0x268] sm:$0xff]  ;;  %202 = vmatpush.msra.mxu0 %v74_v48  ;;  %242 = vmatpush.msra.mxu2 %v75_v50  ;;  %v100_v24 = vld [vmem:[#allocation5 + $0x130] sm:$0xff] }
  0x28   :  { %v70_v52 = vld [vmem:[#allocation5 + $0x40] sm:$0xff]  ;;  %222 = vmatpush.msra.mxu1 %v138_v49  ;;  %v71_v54 = vld [vmem:[#allocation5 + $0x48] sm:$0xff]  ;;  %262 = vmatpush.msra.mxu3 %v139_v51  ;;  %v164_v25 = vld [vmem:[#allocation5 + $0x330] sm:$0xff] }
  0x29   :  { %v134_v53 = vld [vmem:[#allocation5 + $0x240] sm:$0xff]  ;;  %v135_v55 = vld [vmem:[#allocation5 + $0x248] sm:$0xff]  ;;  %203 = vmatpush.msra.mxu0 %v70_v52  ;;  %243 = vmatpush.msra.mxu2 %v71_v54  ;;  %v101_v26 = vld [vmem:[#allocation5 + $0x138] sm:$0xff] }
  0x2a   :  { %v66_v56 = vld [vmem:[#allocation5 + $0x20] sm:$0xff]  ;;  %223 = vmatpush.msra.mxu1 %v134_v53  ;;  %v67_v58 = vld [vmem:[#allocation5 + $0x28] sm:$0xff]  ;;  %263 = vmatpush.msra.mxu3 %v135_v55  ;;  %v165_v27 = vld [vmem:[#allocation5 + $0x338] sm:$0xff] }
  0x2b   :  { %v130_v57 = vld [vmem:[#allocation5 + $0x220] sm:$0xff]  ;;  %v131_v59 = vld [vmem:[#allocation5 + $0x228] sm:$0xff]  ;;  %204 = vmatpush.msra.mxu0 %v66_v56  ;;  %244 = vmatpush.msra.mxu2 %v67_v58  ;;  %v96_v28 = vld [vmem:[#allocation5 + $0x110] sm:$0xff] }
  0x2c   :  { %v62_v60 = vld [vmem:[#allocation5] sm:$0xff]  ;;  %224 = vmatpush.msra.mxu1 %v130_v57  ;;  %v63_v62 = vld [vmem:[#allocation5 + $0x8] sm:$0xff]  ;;  %264 = vmatpush.msra.mxu3 %v131_v59  ;;  %v160_v29 = vld [vmem:[#allocation5 + $0x310] sm:$0xff] }
  0x2d   :  { %v126_v61 = vld [vmem:[#allocation5 + $0x200] sm:$0xff]  ;;  %v127_v63 = vld [vmem:[#allocation5 + $0x208] sm:$0xff]  ;;  %205 = vmatpush.msra.mxu0 %v62_v60  ;;  %245 = vmatpush.msra.mxu2 %v63_v62  ;;  %v97_v30 = vld [vmem:[#allocation5 + $0x118] sm:$0xff] }
  0x2e   :  { %225 = vmatpush.msra.mxu1 %v126_v61  ;;  %265 = vmatpush.msra.mxu3 %v127_v63  ;;  %v161_v31 = vld [vmem:[#allocation5 + $0x318] sm:$0xff]  ;;  %v92_v32 = vld [vmem:[#allocation5 + $0xf0] sm:$0xff] }
  0x2f   :  { %270 = vmatpush.msrb.mxu0 %v124_v0  ;;  %310 = vmatpush.msrb.mxu2 %v125_v2  ;;  %v156_v33 = vld [vmem:[#allocation5 + $0x2f0] sm:$0xff]  ;;  %v93_v34 = vld [vmem:[#allocation5 + $0xf8] sm:$0xff]  ;;  %v419_v2 = vld [vmem:[#allocation5 + $0x5e0] sm:$0xff] }
  0x30   :  { %290 = vmatpush.msrb.mxu1 %v188_v1  ;;  %330 = vmatpush.msrb.mxu3 %v189_v3  ;;  %v157_v35 = vld [vmem:[#allocation5 + $0x2f8] sm:$0xff]  ;;  %v88_v36 = vld [vmem:[#allocation5 + $0xd0] sm:$0xff]  ;;  %v420_v3 = vld [vmem:[#allocation5 + $0x5e8] sm:$0xff] }
  0x31   :  { %271 = vmatpush.msrb.mxu0 %v120_v4  ;;  %311 = vmatpush.msrb.mxu2 %v121_v6  ;;  %v152_v37 = vld [vmem:[#allocation5 + $0x2d0] sm:$0xff]  ;;  %v89_v38 = vld [vmem:[#allocation5 + $0xd8] sm:$0xff]  ;;  %v483_v4 = vld [vmem:[#allocation5 + $0x7e0] sm:$0xff] }
  0x32   :  { %291 = vmatpush.msrb.mxu1 %v184_v5  ;;  %331 = vmatpush.msrb.mxu3 %v185_v7  ;;  %v153_v39 = vld [vmem:[#allocation5 + $0x2d8] sm:$0xff]  ;;  %v84_v40 = vld [vmem:[#allocation5 + $0xb0] sm:$0xff]  ;;  %v484_v5 = vld [vmem:[#allocation5 + $0x7e8] sm:$0xff] }
  0x33   :  { %272 = vmatpush.msrb.mxu0 %v116_v8  ;;  %312 = vmatpush.msrb.mxu2 %v117_v10  ;;  %v148_v41 = vld [vmem:[#allocation5 + $0x2b0] sm:$0xff]  ;;  %v85_v42 = vld [vmem:[#allocation5 + $0xb8] sm:$0xff]  ;;  %v415_v6 = vld [vmem:[#allocation5 + $0x5c0] sm:$0xff] }
  0x34   :  { %292 = vmatpush.msrb.mxu1 %v180_v9  ;;  %332 = vmatpush.msrb.mxu3 %v181_v11  ;;  %v149_v43 = vld [vmem:[#allocation5 + $0x2b8] sm:$0xff]  ;;  %v80_v44 = vld [vmem:[#allocation5 + $0x90] sm:$0xff]  ;;  %v416_v7 = vld [vmem:[#allocation5 + $0x5c8] sm:$0xff] }
  0x35   :  { %273 = vmatpush.msrb.mxu0 %v112_v12  ;;  %313 = vmatpush.msrb.mxu2 %v113_v14  ;;  %v144_v45 = vld [vmem:[#allocation5 + $0x290] sm:$0xff]  ;;  %v81_v46 = vld [vmem:[#allocation5 + $0x98] sm:$0xff]  ;;  %v479_v8 = vld [vmem:[#allocation5 + $0x7c0] sm:$0xff] }
  0x36   :  { %293 = vmatpush.msrb.mxu1 %v176_v13  ;;  %333 = vmatpush.msrb.mxu3 %v177_v15  ;;  %v145_v47 = vld [vmem:[#allocation5 + $0x298] sm:$0xff]  ;;  %v60_v48 = vld [vmem:[#allocation2] sm:$0xff]  ;;  %v480_v9 = vld [vmem:[#allocation5 + $0x7c8] sm:$0xff] }
  0x37   :  { %274 = vmatpush.msrb.mxu0 %v108_v16  ;;  %314 = vmatpush.msrb.mxu2 %v109_v18  ;;  %v61_v49 = vld [vmem:[#allocation2 + $0x8] sm:$0xff]  ;;  %v76_v50 = vld [vmem:[#allocation5 + $0x70] sm:$0xff]  ;;  %v411_v10 = vld [vmem:[#allocation5 + $0x5a0] sm:$0xff] }
  0x38   :  { %294 = vmatpush.msrb.mxu1 %v172_v17  ;;  %334 = vmatpush.msrb.mxu3 %v173_v19  ;;  %v140_v51 = vld [vmem:[#allocation5 + $0x270] sm:$0xff]  ;;  %v77_v52 = vld [vmem:[#allocation5 + $0x78] sm:$0xff]  ;;  %v412_v11 = vld [vmem:[#allocation5 + $0x5a8] sm:$0xff] }
  0x39   :  { %275 = vmatpush.msrb.mxu0 %v104_v20  ;;  %315 = vmatpush.msrb.mxu2 %v105_v22  ;;  %v141_v53 = vld [vmem:[#allocation5 + $0x278] sm:$0xff]  ;;  %v72_v54 = vld [vmem:[#allocation5 + $0x50] sm:$0xff]  ;;  %v475_v12 = vld [vmem:[#allocation5 + $0x7a0] sm:$0xff] }
  0x3a   :  { %295 = vmatpush.msrb.mxu1 %v168_v21  ;;  %335 = vmatpush.msrb.mxu3 %v169_v23  ;;  %v136_v55 = vld [vmem:[#allocation5 + $0x250] sm:$0xff]  ;;  %v73_v56 = vld [vmem:[#allocation5 + $0x58] sm:$0xff]  ;;  %v476_v13 = vld [vmem:[#allocation5 + $0x7a8] sm:$0xff] }
  0x3b   :  { %276 = vmatpush.msrb.mxu0 %v100_v24  ;;  %316 = vmatpush.msrb.mxu2 %v101_v26  ;;  %v137_v57 = vld [vmem:[#allocation5 + $0x258] sm:$0xff]  ;;  %v68_v58 = vld [vmem:[#allocation5 + $0x30] sm:$0xff]  ;;  %v407_v14 = vld [vmem:[#allocation5 + $0x580] sm:$0xff] }
  0x3c   :  { %296 = vmatpush.msrb.mxu1 %v164_v25  ;;  %336 = vmatpush.msrb.mxu3 %v165_v27  ;;  %v132_v59 = vld [vmem:[#allocation5 + $0x230] sm:$0xff]  ;;  %v69_v60 = vld [vmem:[#allocation5 + $0x38] sm:$0xff]  ;;  %v408_v15 = vld [vmem:[#allocation5 + $0x588] sm:$0xff] }
  0x3d   :  { %277 = vmatpush.msrb.mxu0 %v96_v28  ;;  %317 = vmatpush.msrb.mxu2 %v97_v30  ;;  %v133_v61 = vld [vmem:[#allocation5 + $0x238] sm:$0xff]  ;;  %v64_v62 = vld [vmem:[#allocation5 + $0x10] sm:$0xff]  ;;  %v471_v16 = vld [vmem:[#allocation5 + $0x780] sm:$0xff] }
  0x3e   :  { %297 = vmatpush.msrb.mxu1 %v160_v29  ;;  %337 = vmatpush.msrb.mxu3 %v161_v31  ;;  %v128_v63 = vld [vmem:[#allocation5 + $0x210] sm:$0xff]  ;;  %v65_v0 = vld [vmem:[#allocation5 + $0x18] sm:$0xff]  ;;  %v472_v17 = vld [vmem:[#allocation5 + $0x788] sm:$0xff] }
  0x3f   :  { %278 = vmatpush.msrb.mxu0 %v92_v32  ;;  %318 = vmatpush.msrb.mxu2 %v93_v34  ;;  %v129_v1 = vld [vmem:[#allocation5 + $0x218] sm:$0xff]  ;;  %v403_v18 = vld [vmem:[#allocation5 + $0x560] sm:$0xff]  ;;  %v404_v19 = vld [vmem:[#allocation5 + $0x568] sm:$0xff] }
  0x40   :  { %298 = vmatpush.msrb.mxu1 %v156_v33  ;;  %338 = vmatpush.msrb.mxu3 %v157_v35  ;;  %v467_v20 = vld [vmem:[#allocation5 + $0x760] sm:$0xff]  ;;  %v468_v21 = vld [vmem:[#allocation5 + $0x768] sm:$0xff] }
  0x41   :  { %279 = vmatpush.msrb.mxu0 %v88_v36  ;;  %319 = vmatpush.msrb.mxu2 %v89_v38  ;;  %v399_v22 = vld [vmem:[#allocation5 + $0x540] sm:$0xff]  ;;  %v400_v23 = vld [vmem:[#allocation5 + $0x548] sm:$0xff] }
  0x42   :  { %299 = vmatpush.msrb.mxu1 %v152_v37  ;;  %339 = vmatpush.msrb.mxu3 %v153_v39  ;;  %v463_v24 = vld [vmem:[#allocation5 + $0x740] sm:$0xff]  ;;  %v464_v25 = vld [vmem:[#allocation5 + $0x748] sm:$0xff] }
  0x43   :  { %280 = vmatpush.msrb.mxu0 %v84_v40  ;;  %320 = vmatpush.msrb.mxu2 %v85_v42  ;;  %v395_v26 = vld [vmem:[#allocation5 + $0x520] sm:$0xff]  ;;  %v396_v27 = vld [vmem:[#allocation5 + $0x528] sm:$0xff] }
  0x44   :  { %300 = vmatpush.msrb.mxu1 %v148_v41  ;;  %340 = vmatpush.msrb.mxu3 %v149_v43  ;;  %v459_v28 = vld [vmem:[#allocation5 + $0x720] sm:$0xff]  ;;  %v460_v29 = vld [vmem:[#allocation5 + $0x728] sm:$0xff] }
  0x45   :  { %281 = vmatpush.msrb.mxu0 %v80_v44  ;;  %321 = vmatpush.msrb.mxu2 %v81_v46  ;;  %v391_v30 = vld [vmem:[#allocation5 + $0x500] sm:$0xff]  ;;  %v392_v31 = vld [vmem:[#allocation5 + $0x508] sm:$0xff] }
  0x46   :  { %301 = vmatpush.msrb.mxu1 %v144_v45  ;;  %341 = vmatpush.msrb.mxu3 %v145_v47  ;;  %v455_v32 = vld [vmem:[#allocation5 + $0x700] sm:$0xff]  ;;  %v456_v33 = vld [vmem:[#allocation5 + $0x708] sm:$0xff] }
  0x47   :  { %206 = vmatmul.f32.vlgmr.msra.gmra.mxu0 %v60_v48  ;;  %226 = vmatmul.f32.vlgmr.msra.gmra.mxu1 %v61_v49  ;;  %v387_v34 = vld [vmem:[#allocation5 + $0x4e0] sm:$0xff]  ;;  %v388_v35 = vld [vmem:[#allocation5 + $0x4e8] sm:$0xff] }
  0x48   :  { %246 = vmatmul.f32.vlgmr.msra.gmra.mxu2 %v60_v48  ;;  %266 = vmatmul.f32.vlgmr.msra.gmra.mxu3 %v61_v49  ;;  %v451_v36 = vld [vmem:[#allocation5 + $0x6e0] sm:$0xff]  ;;  %v452_v37 = vld [vmem:[#allocation5 + $0x6e8] sm:$0xff] }
  0x49   :  { %282 = vmatpush.msrb.mxu0 %v76_v50  ;;  %302 = vmatpush.msrb.mxu1 %v140_v51  ;;  %v383_v38 = vld [vmem:[#allocation5 + $0x4c0] sm:$0xff]  ;;  %v384_v39 = vld [vmem:[#allocation5 + $0x4c8] sm:$0xff] }
  0x4a   :  { %322 = vmatpush.msrb.mxu2 %v77_v52  ;;  %342 = vmatpush.msrb.mxu3 %v141_v53  ;;  %v447_v40 = vld [vmem:[#allocation5 + $0x6c0] sm:$0xff]  ;;  %v448_v41 = vld [vmem:[#allocation5 + $0x6c8] sm:$0xff] }
  0x4b   :  { %283 = vmatpush.msrb.mxu0 %v72_v54  ;;  %303 = vmatpush.msrb.mxu1 %v136_v55  ;;  %v379_v42 = vld [vmem:[#allocation5 + $0x4a0] sm:$0xff]  ;;  %v380_v43 = vld [vmem:[#allocation5 + $0x4a8] sm:$0xff] }
  0x4c   :  { %323 = vmatpush.msrb.mxu2 %v73_v56  ;;  %343 = vmatpush.msrb.mxu3 %v137_v57  ;;  %v443_v44 = vld [vmem:[#allocation5 + $0x6a0] sm:$0xff]  ;;  %v444_v45 = vld [vmem:[#allocation5 + $0x6a8] sm:$0xff] }
  0x4d   :  { %284 = vmatpush.msrb.mxu0 %v68_v58  ;;  %304 = vmatpush.msrb.mxu1 %v132_v59  ;;  %v375_v46 = vld [vmem:[#allocation5 + $0x480] sm:$0xff]  ;;  %v376_v47 = vld [vmem:[#allocation5 + $0x488] sm:$0xff] }
  0x4e   :  { %324 = vmatpush.msrb.mxu2 %v69_v60  ;;  %344 = vmatpush.msrb.mxu3 %v133_v61  ;;  %v371_v50 = vld [vmem:[#allocation5 + $0x460] sm:$0xff]  ;;  %v372_v51 = vld [vmem:[#allocation5 + $0x468] sm:$0xff] }
  0x4f   :  { %285 = vmatpush.msrb.mxu0 %v64_v62  ;;  %305 = vmatpush.msrb.mxu1 %v128_v63  ;;  %v435_v52 = vld [vmem:[#allocation5 + $0x660] sm:$0xff]  ;;  %v436_v53 = vld [vmem:[#allocation5 + $0x668] sm:$0xff] }
  0x50   :  { %325 = vmatpush.msrb.mxu2 %v65_v0  ;;  %345 = vmatpush.msrb.mxu3 %v129_v1  ;;  %v367_v54 = vld [vmem:[#allocation5 + $0x440] sm:$0xff]  ;;  %v368_v55 = vld [vmem:[#allocation5 + $0x448] sm:$0xff]  ;;  %v421_v0 = vld [vmem:[#allocation5 + $0x5f0] sm:$0xff] }
  0x51   :  { %286 = vmatmul.f32.vlgmr.msrb.gmra.mxu0 %v60_v48  ;;  %306 = vmatmul.f32.vlgmr.msrb.gmra.mxu1 %v61_v49  ;;  %v431_v56 = vld [vmem:[#allocation5 + $0x640] sm:$0xff]  ;;  %v432_v57 = vld [vmem:[#allocation5 + $0x648] sm:$0xff]  ;;  %v422_v1 = vld [vmem:[#allocation5 + $0x5f8] sm:$0xff] }
  0x52   :  { %326 = vmatmul.f32.vlgmr.msrb.gmra.mxu2 %v60_v48  ;;  %346 = vmatmul.f32.vlgmr.msrb.gmra.mxu3 %v61_v49  ;;  %v439_v48 = vld [vmem:[#allocation5 + $0x680] sm:$0xff]  ;;  %v440_v49 = vld [vmem:[#allocation5 + $0x688] sm:$0xff] }
  0x53   :  { %487 = vmatpush.msra.mxu0 %v419_v2  ;;  %527 = vmatpush.msra.mxu2 %v420_v3  ;;  %v363_v58 = vld [vmem:[#allocation5 + $0x420] sm:$0xff]  ;;  %v364_v59 = vld [vmem:[#allocation5 + $0x428] sm:$0xff] }
  0x54   :  { %507 = vmatpush.msra.mxu1 %v483_v4  ;;  %547 = vmatpush.msra.mxu3 %v484_v5  ;;  %v427_v60 = vld [vmem:[#allocation5 + $0x620] sm:$0xff]  ;;  %v428_v61 = vld [vmem:[#allocation5 + $0x628] sm:$0xff]  ;;  %v417_v4 = vld [vmem:[#allocation5 + $0x5d0] sm:$0xff] }
  0x55   :  { %488 = vmatpush.msra.mxu0 %v415_v6  ;;  %528 = vmatpush.msra.mxu2 %v416_v7  ;;  %v359_v62 = vld [vmem:[#allocation5 + $0x400] sm:$0xff]  ;;  %v360_v63 = vld [vmem:[#allocation5 + $0x408] sm:$0xff]  ;;  %v418_v5 = vld [vmem:[#allocation5 + $0x5d8] sm:$0xff] }
  0x56   :  { %508 = vmatpush.msra.mxu1 %v479_v8  ;;  %548 = vmatpush.msra.mxu3 %v480_v9  ;;  %v423_v2 = vld [vmem:[#allocation5 + $0x600] sm:$0xff]  ;;  %v424_v3 = vld [vmem:[#allocation5 + $0x608] sm:$0xff]  ;;  %v413_v6 = vld [vmem:[#allocation5 + $0x5b0] sm:$0xff] }
  0x57   :  { %489 = vmatpush.msra.mxu0 %v411_v10  ;;  %529 = vmatpush.msra.mxu2 %v412_v11  ;;  %v414_v7 = vld [vmem:[#allocation5 + $0x5b8] sm:$0xff]  ;;  %v409_v8 = vld [vmem:[#allocation5 + $0x590] sm:$0xff] }
  0x58   :  { %509 = vmatpush.msra.mxu1 %v475_v12  ;;  %549 = vmatpush.msra.mxu3 %v476_v13  ;;  %v485_v9 = vld [vmem:[#allocation5 + $0x7f0] sm:$0xff]  ;;  %v410_v10 = vld [vmem:[#allocation5 + $0x598] sm:$0xff] }
  0x59   :  { %490 = vmatpush.msra.mxu0 %v407_v14  ;;  %530 = vmatpush.msra.mxu2 %v408_v15  ;;  %v486_v11 = vld [vmem:[#allocation5 + $0x7f8] sm:$0xff]  ;;  %v405_v12 = vld [vmem:[#allocation5 + $0x570] sm:$0xff] }
  0x5a   :  { %510 = vmatpush.msra.mxu1 %v471_v16  ;;  %550 = vmatpush.msra.mxu3 %v472_v17  ;;  %v481_v13 = vld [vmem:[#allocation5 + $0x7d0] sm:$0xff]  ;;  %v406_v14 = vld [vmem:[#allocation5 + $0x578] sm:$0xff] }
  0x5b   :  { %491 = vmatpush.msra.mxu0 %v403_v18  ;;  %531 = vmatpush.msra.mxu2 %v404_v19  ;;  %v482_v15 = vld [vmem:[#allocation5 + $0x7d8] sm:$0xff]  ;;  %v401_v16 = vld [vmem:[#allocation5 + $0x550] sm:$0xff] }
  0x5c   :  { %511 = vmatpush.msra.mxu1 %v467_v20  ;;  %551 = vmatpush.msra.mxu3 %v468_v21  ;;  %v477_v17 = vld [vmem:[#allocation5 + $0x7b0] sm:$0xff]  ;;  %v402_v18 = vld [vmem:[#allocation5 + $0x558] sm:$0xff] }
  0x5d   :  { %492 = vmatpush.msra.mxu0 %v399_v22  ;;  %532 = vmatpush.msra.mxu2 %v400_v23  ;;  %v478_v19 = vld [vmem:[#allocation5 + $0x7b8] sm:$0xff]  ;;  %v397_v20 = vld [vmem:[#allocation5 + $0x530] sm:$0xff] }
  0x5e   :  { %512 = vmatpush.msra.mxu1 %v463_v24  ;;  %552 = vmatpush.msra.mxu3 %v464_v25  ;;  %v473_v21 = vld [vmem:[#allocation5 + $0x790] sm:$0xff]  ;;  %v398_v22 = vld [vmem:[#allocation5 + $0x538] sm:$0xff] }
  0x5f   :  { %493 = vmatpush.msra.mxu0 %v395_v26  ;;  %533 = vmatpush.msra.mxu2 %v396_v27  ;;  %v474_v23 = vld [vmem:[#allocation5 + $0x798] sm:$0xff]  ;;  %v393_v24 = vld [vmem:[#allocation5 + $0x510] sm:$0xff] }
  0x60   :  { %513 = vmatpush.msra.mxu1 %v459_v28  ;;  %553 = vmatpush.msra.mxu3 %v460_v29  ;;  %v469_v25 = vld [vmem:[#allocation5 + $0x770] sm:$0xff]  ;;  %v394_v26 = vld [vmem:[#allocation5 + $0x518] sm:$0xff] }
  0x61   :  { %494 = vmatpush.msra.mxu0 %v391_v30  ;;  %534 = vmatpush.msra.mxu2 %v392_v31  ;;  %v470_v27 = vld [vmem:[#allocation5 + $0x778] sm:$0xff]  ;;  %v389_v28 = vld [vmem:[#allocation5 + $0x4f0] sm:$0xff] }
  0x62   :  { %514 = vmatpush.msra.mxu1 %v455_v32  ;;  %554 = vmatpush.msra.mxu3 %v456_v33  ;;  %v465_v29 = vld [vmem:[#allocation5 + $0x750] sm:$0xff]  ;;  %v390_v30 = vld [vmem:[#allocation5 + $0x4f8] sm:$0xff] }
  0x63   :  { %495 = vmatpush.msra.mxu0 %v387_v34  ;;  %535 = vmatpush.msra.mxu2 %v388_v35  ;;  %v466_v31 = vld [vmem:[#allocation5 + $0x758] sm:$0xff]  ;;  %v385_v32 = vld [vmem:[#allocation5 + $0x4d0] sm:$0xff] }
  0x64   :  { %515 = vmatpush.msra.mxu1 %v451_v36  ;;  %555 = vmatpush.msra.mxu3 %v452_v37  ;;  %v461_v33 = vld [vmem:[#allocation5 + $0x730] sm:$0xff]  ;;  %v386_v34 = vld [vmem:[#allocation5 + $0x4d8] sm:$0xff] }
  0x65   :  { %496 = vmatpush.msra.mxu0 %v383_v38  ;;  %536 = vmatpush.msra.mxu2 %v384_v39  ;;  %v462_v35 = vld [vmem:[#allocation5 + $0x738] sm:$0xff]  ;;  %v381_v36 = vld [vmem:[#allocation5 + $0x4b0] sm:$0xff] }
  0x66   :  { %516 = vmatpush.msra.mxu1 %v447_v40  ;;  %556 = vmatpush.msra.mxu3 %v448_v41  ;;  %v457_v37 = vld [vmem:[#allocation5 + $0x710] sm:$0xff]  ;;  %v382_v38 = vld [vmem:[#allocation5 + $0x4b8] sm:$0xff] }
  0x67   :  { %497 = vmatpush.msra.mxu0 %v379_v42  ;;  %537 = vmatpush.msra.mxu2 %v380_v43  ;;  %v458_v39 = vld [vmem:[#allocation5 + $0x718] sm:$0xff]  ;;  %v377_v40 = vld [vmem:[#allocation5 + $0x490] sm:$0xff] }
  0x68   :  { %517 = vmatpush.msra.mxu1 %v443_v44  ;;  %557 = vmatpush.msra.mxu3 %v444_v45  ;;  %v453_v41 = vld [vmem:[#allocation5 + $0x6f0] sm:$0xff]  ;;  %v378_v42 = vld [vmem:[#allocation5 + $0x498] sm:$0xff] }
  0x69   :  { %498 = vmatpush.msra.mxu0 %v375_v46  ;;  %538 = vmatpush.msra.mxu2 %v376_v47  ;;  %v454_v43 = vld [vmem:[#allocation5 + $0x6f8] sm:$0xff]  ;;  %v373_v44 = vld [vmem:[#allocation5 + $0x470] sm:$0xff] }
  0x6a   :  { %518 = vmatpush.msra.mxu1 %v439_v48  ;;  %558 = vmatpush.msra.mxu3 %v440_v49  ;;  %v449_v45 = vld [vmem:[#allocation5 + $0x6d0] sm:$0xff]  ;;  %v374_v46 = vld [vmem:[#allocation5 + $0x478] sm:$0xff] }
  0x6b   :  { %499 = vmatpush.msra.mxu0 %v371_v50  ;;  %539 = vmatpush.msra.mxu2 %v372_v51  ;;  %v450_v47 = vld [vmem:[#allocation5 + $0x6d8] sm:$0xff]  ;;  %v369_v48 = vld [vmem:[#allocation5 + $0x450] sm:$0xff] }
  0x6c   :  { %519 = vmatpush.msra.mxu1 %v435_v52  ;;  %559 = vmatpush.msra.mxu3 %v436_v53  ;;  %v445_v49 = vld [vmem:[#allocation5 + $0x6b0] sm:$0xff]  ;;  %v370_v50 = vld [vmem:[#allocation5 + $0x458] sm:$0xff] }
  0x6d   :  { %500 = vmatpush.msra.mxu0 %v367_v54  ;;  %540 = vmatpush.msra.mxu2 %v368_v55  ;;  %v446_v51 = vld [vmem:[#allocation5 + $0x6b8] sm:$0xff]  ;;  %v365_v52 = vld [vmem:[#allocation5 + $0x430] sm:$0xff] }
  0x6e   :  { %520 = vmatpush.msra.mxu1 %v431_v56  ;;  %560 = vmatpush.msra.mxu3 %v432_v57  ;;  %v441_v53 = vld [vmem:[#allocation5 + $0x690] sm:$0xff]  ;;  %v366_v54 = vld [vmem:[#allocation5 + $0x438] sm:$0xff] }
  0x6f   :  { %501 = vmatpush.msra.mxu0 %v363_v58  ;;  %541 = vmatpush.msra.mxu2 %v364_v59  ;;  %v442_v55 = vld [vmem:[#allocation5 + $0x698] sm:$0xff]  ;;  %v361_v56 = vld [vmem:[#allocation5 + $0x410] sm:$0xff] }
  0x70   :  { %521 = vmatpush.msra.mxu1 %v427_v60  ;;  %561 = vmatpush.msra.mxu3 %v428_v61  ;;  %v437_v57 = vld [vmem:[#allocation5 + $0x670] sm:$0xff]  ;;  %v362_v58 = vld [vmem:[#allocation5 + $0x418] sm:$0xff] }
  0x71   :  { %502 = vmatpush.msra.mxu0 %v359_v62  ;;  %542 = vmatpush.msra.mxu2 %v360_v63  ;;  %v438_v59 = vld [vmem:[#allocation5 + $0x678] sm:$0xff]  ;;  %v433_v60 = vld [vmem:[#allocation5 + $0x650] sm:$0xff] }
  0x72   :  { %522 = vmatpush.msra.mxu1 %v423_v2  ;;  %562 = vmatpush.msra.mxu3 %v424_v3  ;;  %v434_v61 = vld [vmem:[#allocation5 + $0x658] sm:$0xff]  ;;  %v429_v62 = vld [vmem:[#allocation5 + $0x630] sm:$0xff] }
  0x73   :  { %567 = vmatpush.msrb.mxu0 %v421_v0  ;;  %607 = vmatpush.msrb.mxu2 %v422_v1  ;;  %v430_v63 = vld [vmem:[#allocation5 + $0x638] sm:$0xff]  ;;  %v425_v0 = vld [vmem:[#allocation5 + $0x610] sm:$0xff] }
  0x74   :  { %587 = vmatpush.msrb.mxu1 %v485_v9  ;;  %627 = vmatpush.msrb.mxu3 %v486_v11  ;;  %v426_v1 = vld [vmem:[#allocation5 + $0x618] sm:$0xff] }
  0x75   :  { %568 = vmatpush.msrb.mxu0 %v417_v4  ;;  %608 = vmatpush.msrb.mxu2 %v418_v5 }
  0x76   :  { %588 = vmatpush.msrb.mxu1 %v481_v13  ;;  %628 = vmatpush.msrb.mxu3 %v482_v15 }
  0x77   :  { %569 = vmatpush.msrb.mxu0 %v413_v6  ;;  %609 = vmatpush.msrb.mxu2 %v414_v7  ;;  %v1758_v6 = vld [vmem:[#allocation7] sm:$0xff] }
  0x78   :  { %589 = vmatpush.msrb.mxu1 %v477_v17  ;;  %629 = vmatpush.msrb.mxu3 %v478_v19  ;;  %v352_v11 = vperm.slane %v1758_v6, 0  ;;  %v687_v19 = vld [vmem:[#allocation5 + $0x9e8] sm:$0xff] }
  0x79   :  { %570 = vmatpush.msrb.mxu0 %v409_v8  ;;  %610 = vmatpush.msrb.mxu2 %v410_v10 }
  0x7a   :  { %590 = vmatpush.msrb.mxu1 %v473_v21  ;;  %630 = vmatpush.msrb.mxu3 %v474_v23  ;;  %v684_v23 = vld [vmem:[#allocation5 + $0x9c0] sm:$0xff] }
  0x7b   :  { %571 = vmatpush.msrb.mxu0 %v405_v12  ;;  %611 = vmatpush.msrb.mxu2 %v406_v14  ;;  %v1761_v14 = vld [vmem:[#allocation7 + $0x8] sm:$0xff] }
  0x7c   :  { %591 = vmatpush.msrb.mxu1 %v469_v25  ;;  %631 = vmatpush.msrb.mxu3 %v470_v27  ;;  %v683_v27 = vld [vmem:[#allocation5 + $0x9a8] sm:$0xff] }
  0x7d   :  { %572 = vmatpush.msrb.mxu0 %v401_v16  ;;  %612 = vmatpush.msrb.mxu2 %v402_v18  ;;  %v686_v18 = vld [vmem:[#allocation5 + $0x9e0] sm:$0xff] }
  0x7e   :  { %592 = vmatpush.msrb.mxu1 %v465_v29  ;;  %632 = vmatpush.msrb.mxu3 %v466_v31  ;;  %v718_v31 = vld [vmem:[#allocation5 + $0xbe0] sm:$0xff] }
  0x7f   :  { %573 = vmatpush.msrb.mxu0 %v397_v20  ;;  %613 = vmatpush.msrb.mxu2 %v398_v22  ;;  %v353_v22 = vperm.slane %v1761_v14, 0 }
  0x80   :  { %593 = vmatpush.msrb.mxu1 %v461_v33  ;;  %633 = vmatpush.msrb.mxu3 %v462_v35  ;;  %v719_v33 = vld [vmem:[#allocation5 + $0xbe8] sm:$0xff]  ;;  %v716_v35 = vld [vmem:[#allocation5 + $0xbc0] sm:$0xff] }
  0x81   :  { %574 = vmatpush.msrb.mxu0 %v393_v24  ;;  %614 = vmatpush.msrb.mxu2 %v394_v26  ;;  %v685_v24 = vld [vmem:[#allocation5 + $0x9c8] sm:$0xff]  ;;  %v682_v26 = vld [vmem:[#allocation5 + $0x9a0] sm:$0xff] }
  0x82   :  { %594 = vmatpush.msrb.mxu1 %v457_v37  ;;  %634 = vmatpush.msrb.mxu3 %v458_v39  ;;  %v717_v37 = vld [vmem:[#allocation5 + $0xbc8] sm:$0xff]  ;;  %v714_v39 = vld [vmem:[#allocation5 + $0xba0] sm:$0xff] }
  0x83   :  { %575 = vmatpush.msrb.mxu0 %v389_v28  ;;  %615 = vmatpush.msrb.mxu2 %v390_v30  ;;  %v680_v30 = vld [vmem:[#allocation5 + $0x980] sm:$0xff] }
  0x84   :  { %595 = vmatpush.msrb.mxu1 %v453_v41  ;;  %635 = vmatpush.msrb.mxu3 %v454_v43  ;;  %v715_v41 = vld [vmem:[#allocation5 + $0xba8] sm:$0xff]  ;;  %v712_v43 = vld [vmem:[#allocation5 + $0xb80] sm:$0xff] }
  0x85   :  { %576 = vmatpush.msrb.mxu0 %v385_v32  ;;  %616 = vmatpush.msrb.mxu2 %v386_v34  ;;  %v681_v32 = vld [vmem:[#allocation5 + $0x988] sm:$0xff]  ;;  %v678_v34 = vld [vmem:[#allocation5 + $0x960] sm:$0xff] }
  0x86   :  { %596 = vmatpush.msrb.mxu1 %v449_v45  ;;  %636 = vmatpush.msrb.mxu3 %v450_v47  ;;  %v713_v45 = vld [vmem:[#allocation5 + $0xb88] sm:$0xff]  ;;  %v710_v47 = vld [vmem:[#allocation5 + $0xb60] sm:$0xff] }
  0x87   :  { %577 = vmatpush.msrb.mxu0 %v381_v36  ;;  %617 = vmatpush.msrb.mxu2 %v382_v38  ;;  %v679_v36 = vld [vmem:[#allocation5 + $0x968] sm:$0xff]  ;;  %v676_v38 = vld [vmem:[#allocation5 + $0x940] sm:$0xff] }
  0x88   :  { %597 = vmatpush.msrb.mxu1 %v445_v49  ;;  %637 = vmatpush.msrb.mxu3 %v446_v51  ;;  %v711_v49 = vld [vmem:[#allocation5 + $0xb68] sm:$0xff]  ;;  %v708_v51 = vld [vmem:[#allocation5 + $0xb40] sm:$0xff] }
  0x89   :  { %578 = vmatpush.msrb.mxu0 %v377_v40  ;;  %618 = vmatpush.msrb.mxu2 %v378_v42  ;;  %v677_v40 = vld [vmem:[#allocation5 + $0x948] sm:$0xff]  ;;  %v674_v42 = vld [vmem:[#allocation5 + $0x920] sm:$0xff] }
  0x8a   :  { %598 = vmatpush.msrb.mxu1 %v441_v53  ;;  %638 = vmatpush.msrb.mxu3 %v442_v55  ;;  %v709_v53 = vld [vmem:[#allocation5 + $0xb48] sm:$0xff]  ;;  %v706_v55 = vld [vmem:[#allocation5 + $0xb20] sm:$0xff] }
  0x8b   :  { %579 = vmatpush.msrb.mxu0 %v373_v44  ;;  %619 = vmatpush.msrb.mxu2 %v374_v46  ;;  %v675_v44 = vld [vmem:[#allocation5 + $0x928] sm:$0xff]  ;;  %v672_v46 = vld [vmem:[#allocation5 + $0x900] sm:$0xff] }
  0x8c   :  { %599 = vmatpush.msrb.mxu1 %v437_v57  ;;  %639 = vmatpush.msrb.mxu3 %v438_v59  ;;  %v707_v57 = vld [vmem:[#allocation5 + $0xb28] sm:$0xff]  ;;  %v704_v59 = vld [vmem:[#allocation5 + $0xb00] sm:$0xff] }
  0x8d   :  { %580 = vmatpush.msrb.mxu0 %v369_v48  ;;  %620 = vmatpush.msrb.mxu2 %v370_v50  ;;  %v673_v48 = vld [vmem:[#allocation5 + $0x908] sm:$0xff]  ;;  %v670_v50 = vld [vmem:[#allocation5 + $0x8e0] sm:$0xff] }
  0x8e   :  { %600 = vmatpush.msrb.mxu1 %v433_v60  ;;  %640 = vmatpush.msrb.mxu3 %v434_v61  ;;  %v667_v60 = vld [vmem:[#allocation5 + $0x8a8] sm:$0xff] }
  0x8f   :  { %581 = vmatpush.msrb.mxu0 %v365_v52  ;;  %621 = vmatpush.msrb.mxu2 %v366_v54  ;;  %v671_v52 = vld [vmem:[#allocation5 + $0x8e8] sm:$0xff]  ;;  %v668_v54 = vld [vmem:[#allocation5 + $0x8c0] sm:$0xff] }
  0x90   :  { %601 = vmatpush.msrb.mxu1 %v429_v62  ;;  %641 = vmatpush.msrb.mxu3 %v430_v63  ;;  %v705_v61 = vld [vmem:[#allocation5 + $0xb08] sm:$0xff]  ;;  %v664_v62 = vld [vmem:[#allocation5 + $0x880] sm:$0xff] }
  0x91   :  { %582 = vmatpush.msrb.mxu0 %v361_v56  ;;  %622 = vmatpush.msrb.mxu2 %v362_v58  ;;  %v669_v56 = vld [vmem:[#allocation5 + $0x8c8] sm:$0xff]  ;;  %v666_v58 = vld [vmem:[#allocation5 + $0x8a0] sm:$0xff] }
  0x92   :  { %602 = vmatpush.msrb.mxu1 %v425_v0  ;;  %642 = vmatpush.msrb.mxu3 %v426_v1  ;;  %v702_v63 = vld [vmem:[#allocation5 + $0xae0] sm:$0xff]  ;;  %v665_v0 = vld [vmem:[#allocation5 + $0x888] sm:$0xff] }
  0x93   :  { %v703_v1 = vld [vmem:[#allocation5 + $0xae8] sm:$0xff] }
  0xc4   :  { %v207_v2 = vpop.f32.mrf.mxu0  ;;  %v227_v3 = vpop.f32.mrf.mxu1 }
  0xc5   :  { %v228_v9 = vadd.f32 %v227_v3, %v207_v2  ;;  %v662_v2 = vld [vmem:[#allocation5 + $0x860] sm:$0xff] }
  0xc6   :  { %v700_v3 = vld [vmem:[#allocation5 + $0xac0] sm:$0xff] }
  0xcb   :  { %v247_v4 = vpop.f32.mrf.mxu2  ;;  %v267_v5 = vpop.f32.mrf.mxu3 }
  0xcc   :  { %v268_v20 = vadd.f32 %v267_v5, %v247_v4  ;;  %v663_v4 = vld [vmem:[#allocation5 + $0x868] sm:$0xff] }
  0xcd   :  { %v701_v5 = vld [vmem:[#allocation5 + $0xac8] sm:$0xff] }
  0xce   :  { %v287_v7 = vpop.f32.mrf.mxu0  ;;  %v307_v8 = vpop.f32.mrf.mxu1 }
  0xcf   :  { %v308_v10 = vadd.f32 %v307_v8, %v287_v7  ;;  %v660_v7 = vld [vmem:[#allocation5 + $0x840] sm:$0xff] }
  0xd0   :  { %v698_v8 = vld [vmem:[#allocation5 + $0xaa0] sm:$0xff] }
  0xd1   :  { %v350_v12 = vmax.f32 %v228_v9, %v308_v10  ;;  %v661_v9 = vld [vmem:[#allocation5 + $0x848] sm:$0xff] }
  0xd2   :  { %v699_v10 = vld [vmem:[#allocation5 + $0xaa8] sm:$0xff] }
  0xd3   :  { %v354_v13 = vadd.f32 %v352_v11, %v350_v12  ;;  %v658_v11 = vld [vmem:[#allocation5 + $0x820] sm:$0xff] }
  0xd4   :  { %v696_v12 = vld [vmem:[#allocation5 + $0xa80] sm:$0xff] }
  0xd5   :  { %v356_v15 = vmax.f32 %v354_v13, 0.0  ;;  %v327_v16 = vpop.f32.mrf.mxu2  ;;  %v347_v17 = vpop.f32.mrf.mxu3  ;;  %v659_v13 = vld [vmem:[#allocation5 + $0x828] sm:$0xff] }
  0xd6   :  { %v348_v21 = vadd.f32 %v347_v17, %v327_v16  ;;  %v656_v16 = vld [vmem:[#allocation5 + $0x800] sm:$0xff] }
  0xd7   :  { %503 = vmatmul.f32.vlgmr.msra.gmra.mxu0 %v356_v15  ;;  %543 = vmatmul.f32.vlgmr.msra.gmra.mxu2 %v356_v15  ;;  %v694_v17 = vld [vmem:[#allocation5 + $0xa60] sm:$0xff] }
  0xd8   :  { %v351_v25 = vmax.f32 %v268_v20, %v348_v21  ;;  %722 = vmatpush.msra.mxu0 %v686_v18  ;;  %762 = vmatpush.msra.mxu2 %v687_v19  ;;  %v657_v18 = vld [vmem:[#allocation5 + $0x808] sm:$0xff]  ;;  %v692_v20 = vld [vmem:[#allocation5 + $0xa40] sm:$0xff] }
  0xd9   :  { %v695_v19 = vld [vmem:[#allocation5 + $0xa68] sm:$0xff] }
  0xda   :  { %v355_v28 = vadd.f32 %v353_v22, %v351_v25  ;;  %723 = vmatpush.msra.mxu0 %v684_v23  ;;  %763 = vmatpush.msra.mxu2 %v685_v24  ;;  %v693_v21 = vld [vmem:[#allocation5 + $0xa48] sm:$0xff]  ;;  %v690_v22 = vld [vmem:[#allocation5 + $0xa20] sm:$0xff] }
  0xdb   :  { %v691_v23 = vld [vmem:[#allocation5 + $0xa28] sm:$0xff]  ;;  %v688_v24 = vld [vmem:[#allocation5 + $0xa00] sm:$0xff] }
  0xdc   :  { %v357_v29 = vmax.f32 %v355_v28, 0.0  ;;  %724 = vmatpush.msra.mxu0 %v682_v26  ;;  %764 = vmatpush.msra.mxu2 %v683_v27  ;;  %v689_v25 = vld [vmem:[#allocation5 + $0xa08] sm:$0xff]  ;;  %v835_v26 = vld [vmem:[#allocation5 + $0xde0] sm:$0xff] }
  0xdd   :  { %v836_v27 = vld [vmem:[#allocation5 + $0xde8] sm:$0xff]  ;;  %v833_v28 = vld [vmem:[#allocation5 + $0xdc0] sm:$0xff] }
  0xde   :  { %523 = vmatmul.f32.vlgmr.msra.gmra.mxu1 %v357_v29  ;;  %563 = vmatmul.f32.vlgmr.msra.gmra.mxu3 %v357_v29 }
  0xdf   :  { %583 = vmatmul.f32.vlgmr.msrb.gmra.mxu0 %v356_v15  ;;  %623 = vmatmul.f32.vlgmr.msrb.gmra.mxu2 %v356_v15  ;;  %v697_v15 = vld [vmem:[#allocation5 + $0xa88] sm:$0xff] }
  0xe0   :  { %725 = vmatpush.msra.mxu0 %v680_v30  ;;  %742 = vmatpush.msra.mxu1 %v718_v31  ;;  %v831_v30 = vld [vmem:[#allocation5 + $0xda0] sm:$0xff]  ;;  %v832_v31 = vld [vmem:[#allocation5 + $0xda8] sm:$0xff] }
  0xe1   :  { %765 = vmatpush.msra.mxu2 %v681_v32  ;;  %782 = vmatpush.msra.mxu3 %v719_v33  ;;  %v867_v32 = vld [vmem:[#allocation5 + $0xfe0] sm:$0xff]  ;;  %v868_v33 = vld [vmem:[#allocation5 + $0xfe8] sm:$0xff] }
  0xe2   :  { %726 = vmatpush.msra.mxu0 %v678_v34  ;;  %743 = vmatpush.msra.mxu1 %v716_v35  ;;  %v865_v34 = vld [vmem:[#allocation5 + $0xfc0] sm:$0xff] }
  0xe3   :  { %766 = vmatpush.msra.mxu2 %v679_v36  ;;  %783 = vmatpush.msra.mxu3 %v717_v37  ;;  %v829_v35 = vld [vmem:[#allocation5 + $0xd80] sm:$0xff]  ;;  %v830_v36 = vld [vmem:[#allocation5 + $0xd88] sm:$0xff] }
  0xe4   :  { %727 = vmatpush.msra.mxu0 %v676_v38  ;;  %744 = vmatpush.msra.mxu1 %v714_v39  ;;  %v866_v37 = vld [vmem:[#allocation5 + $0xfc8] sm:$0xff]  ;;  %v863_v38 = vld [vmem:[#allocation5 + $0xfa0] sm:$0xff] }
  0xe5   :  { %767 = vmatpush.msra.mxu2 %v677_v40  ;;  %784 = vmatpush.msra.mxu3 %v715_v41  ;;  %v864_v39 = vld [vmem:[#allocation5 + $0xfa8] sm:$0xff]  ;;  %v827_v40 = vld [vmem:[#allocation5 + $0xd60] sm:$0xff] }
  0xe6   :  { %603 = vmatmul.f32.vlgmr.msrb.gmra.mxu1 %v357_v29  ;;  %643 = vmatmul.f32.vlgmr.msrb.gmra.mxu3 %v357_v29  ;;  %v834_v29 = vld [vmem:[#allocation5 + $0xdc8] sm:$0xff] }
  0xe7   :  { %728 = vmatpush.msra.mxu0 %v674_v42  ;;  %745 = vmatpush.msra.mxu1 %v712_v43  ;;  %v828_v41 = vld [vmem:[#allocation5 + $0xd68] sm:$0xff]  ;;  %v861_v43 = vld [vmem:[#allocation5 + $0xf80] sm:$0xff] }
  0xe8   :  { %768 = vmatpush.msra.mxu2 %v675_v44  ;;  %785 = vmatpush.msra.mxu3 %v713_v45  ;;  %v862_v44 = vld [vmem:[#allocation5 + $0xf88] sm:$0xff]  ;;  %v825_v45 = vld [vmem:[#allocation5 + $0xd40] sm:$0xff] }
  0xe9   :  { %729 = vmatpush.msra.mxu0 %v672_v46  ;;  %746 = vmatpush.msra.mxu1 %v710_v47  ;;  %v826_v46 = vld [vmem:[#allocation5 + $0xd48] sm:$0xff] }
  0xea   :  { %769 = vmatpush.msra.mxu2 %v673_v48  ;;  %786 = vmatpush.msra.mxu3 %v711_v49  ;;  %v859_v48 = vld [vmem:[#allocation5 + $0xf60] sm:$0xff]  ;;  %v860_v49 = vld [vmem:[#allocation5 + $0xf68] sm:$0xff] }
  0xeb   :  { %730 = vmatpush.msra.mxu0 %v670_v50  ;;  %747 = vmatpush.msra.mxu1 %v708_v51  ;;  %v823_v50 = vld [vmem:[#allocation5 + $0xd20] sm:$0xff]  ;;  %v824_v51 = vld [vmem:[#allocation5 + $0xd28] sm:$0xff] }
  0xec   :  { %770 = vmatpush.msra.mxu2 %v671_v52  ;;  %787 = vmatpush.msra.mxu3 %v709_v53  ;;  %v857_v52 = vld [vmem:[#allocation5 + $0xf40] sm:$0xff]  ;;  %v858_v53 = vld [vmem:[#allocation5 + $0xf48] sm:$0xff] }
  0xed   :  { %731 = vmatpush.msra.mxu0 %v668_v54  ;;  %748 = vmatpush.msra.mxu1 %v706_v55  ;;  %v821_v54 = vld [vmem:[#allocation5 + $0xd00] sm:$0xff]  ;;  %v822_v55 = vld [vmem:[#allocation5 + $0xd08] sm:$0xff] }
  0xee   :  { %771 = vmatpush.msra.mxu2 %v669_v56  ;;  %788 = vmatpush.msra.mxu3 %v707_v57  ;;  %v855_v57 = vld [vmem:[#allocation5 + $0xf20] sm:$0xff] }
  0xef   :  { %732 = vmatpush.msra.mxu0 %v666_v58  ;;  %749 = vmatpush.msra.mxu1 %v704_v59  ;;  %v856_v58 = vld [vmem:[#allocation5 + $0xf28] sm:$0xff]  ;;  %v819_v59 = vld [vmem:[#allocation5 + $0xce0] sm:$0xff] }
  0xf0   :  { %772 = vmatpush.msra.mxu2 %v667_v60  ;;  %789 = vmatpush.msra.mxu3 %v705_v61  ;;  %v820_v60 = vld [vmem:[#allocation5 + $0xce8] sm:$0xff] }
  0xf1   :  { %733 = vmatpush.msra.mxu0 %v664_v62  ;;  %750 = vmatpush.msra.mxu1 %v702_v63  ;;  %v817_v62 = vld [vmem:[#allocation5 + $0xcc0] sm:$0xff]  ;;  %v818_v63 = vld [vmem:[#allocation5 + $0xcc8] sm:$0xff] }
  0xf2   :  { %773 = vmatpush.msra.mxu2 %v665_v0  ;;  %790 = vmatpush.msra.mxu3 %v703_v1 }
  0xf3   :  { %734 = vmatpush.msra.mxu0 %v662_v2  ;;  %751 = vmatpush.msra.mxu1 %v700_v3 }
  0xf4   :  { %774 = vmatpush.msra.mxu2 %v663_v4  ;;  %791 = vmatpush.msra.mxu3 %v701_v5  ;;  %v649_v4 = vperm.slane %v1758_v6, 1 }
  0xf5   :  { %735 = vmatpush.msra.mxu0 %v660_v7  ;;  %752 = vmatpush.msra.mxu1 %v698_v8 }
  0xf6   :  { %775 = vmatpush.msra.mxu2 %v661_v9  ;;  %792 = vmatpush.msra.mxu3 %v699_v10 }
  0xf7   :  { %736 = vmatpush.msra.mxu0 %v658_v11  ;;  %753 = vmatpush.msra.mxu1 %v696_v12 }
  0xf8   :  { %776 = vmatpush.msra.mxu2 %v659_v13  ;;  %793 = vmatpush.msra.mxu3 %v697_v15  ;;  %v650_v13 = vperm.slane %v1761_v14, 1 }
  0xf9   :  { %737 = vmatpush.msra.mxu0 %v656_v16  ;;  %754 = vmatpush.msra.mxu1 %v694_v17 }
  0xfa   :  { %777 = vmatpush.msra.mxu2 %v657_v18  ;;  %794 = vmatpush.msra.mxu3 %v695_v19  ;;  %v815_v18 = vld [vmem:[#allocation5 + $0xca0] sm:$0xff] }
  0xfb   :  { %755 = vmatpush.msra.mxu1 %v692_v20  ;;  %871 = vmatpush.msrb.mxu0 %v835_v26  ;;  %v853_v19 = vld [vmem:[#allocation5 + $0xf00] sm:$0xff]  ;;  %v816_v20 = vld [vmem:[#allocation5 + $0xca8] sm:$0xff] }
  0xfc   :  { %795 = vmatpush.msra.mxu3 %v693_v21  ;;  %911 = vmatpush.msrb.mxu2 %v836_v27  ;;  %v854_v21 = vld [vmem:[#allocation5 + $0xf08] sm:$0xff]  ;;  %v811_v26 = vld [vmem:[#allocation5 + $0xc60] sm:$0xff] }
  0xfd   :  { %756 = vmatpush.msra.mxu1 %v690_v22  ;;  %872 = vmatpush.msrb.mxu0 %v833_v28  ;;  %v813_v22 = vld [vmem:[#allocation5 + $0xc80] sm:$0xff]  ;;  %v812_v28 = vld [vmem:[#allocation5 + $0xc68] sm:$0xff] }
  0xfe   :  { %796 = vmatpush.msra.mxu3 %v691_v23  ;;  %912 = vmatpush.msrb.mxu2 %v834_v29  ;;  %v851_v23 = vld [vmem:[#allocation5 + $0xee0] sm:$0xff]  ;;  %v850_v29 = vld [vmem:[#allocation5 + $0xec8] sm:$0xff] }
  0xff   :  { %757 = vmatpush.msra.mxu1 %v688_v24  ;;  %873 = vmatpush.msrb.mxu0 %v831_v30  ;;  %v814_v24 = vld [vmem:[#allocation5 + $0xc88] sm:$0xff]  ;;  %v849_v27 = vld [vmem:[#allocation5 + $0xec0] sm:$0xff] }
 0x100   :  { %797 = vmatpush.msra.mxu3 %v689_v25  ;;  %913 = vmatpush.msrb.mxu2 %v832_v31  ;;  %v852_v25 = vld [vmem:[#allocation5 + $0xee8] sm:$0xff]  ;;  %v809_v30 = vld [vmem:[#allocation5 + $0xc40] sm:$0xff] }
 0x101   :  { %891 = vmatpush.msrb.mxu1 %v867_v32  ;;  %874 = vmatpush.msrb.mxu0 %v829_v35  ;;  %v847_v31 = vld [vmem:[#allocation5 + $0xea0] sm:$0xff]  ;;  %v810_v32 = vld [vmem:[#allocation5 + $0xc48] sm:$0xff] }
 0x102   :  { %931 = vmatpush.msrb.mxu3 %v868_v33  ;;  %914 = vmatpush.msrb.mxu2 %v830_v36  ;;  %v848_v33 = vld [vmem:[#allocation5 + $0xea8] sm:$0xff]  ;;  %v845_v35 = vld [vmem:[#allocation5 + $0xe80] sm:$0xff] }
 0x103   :  { %892 = vmatpush.msrb.mxu1 %v865_v34  ;;  %875 = vmatpush.msrb.mxu0 %v827_v40  ;;  %v807_v34 = vld [vmem:[#allocation5 + $0xc20] sm:$0xff]  ;;  %v808_v36 = vld [vmem:[#allocation5 + $0xc28] sm:$0xff] }
 0x104   :  { %932 = vmatpush.msrb.mxu3 %v866_v37  ;;  %915 = vmatpush.msrb.mxu2 %v828_v41  ;;  %v846_v37 = vld [vmem:[#allocation5 + $0xe88] sm:$0xff] }
 0x105   :  { %893 = vmatpush.msrb.mxu1 %v863_v38  ;;  %876 = vmatpush.msrb.mxu0 %v825_v45  ;;  %v805_v38 = vld [vmem:[#allocation5 + $0xc00] sm:$0xff]  ;;  %v806_v40 = vld [vmem:[#allocation5 + $0xc08] sm:$0xff] }
 0x106   :  { %933 = vmatpush.msrb.mxu3 %v864_v39  ;;  %916 = vmatpush.msrb.mxu2 %v826_v46  ;;  %v843_v39 = vld [vmem:[#allocation5 + $0xe60] sm:$0xff]  ;;  %v844_v41 = vld [vmem:[#allocation5 + $0xe68] sm:$0xff] }
 0x107   :  { %894 = vmatpush.msrb.mxu1 %v861_v43  ;;  %877 = vmatpush.msrb.mxu0 %v823_v50  ;;  %v842_v43 = vld [vmem:[#allocation5 + $0xe48] sm:$0xff]  ;;  %v837_v46 = vld [vmem:[#allocation5 + $0xe00] sm:$0xff] }
 0x108   :  { %934 = vmatpush.msrb.mxu3 %v862_v44  ;;  %917 = vmatpush.msrb.mxu2 %v824_v51  ;;  %v839_v44 = vld [vmem:[#allocation5 + $0xe20] sm:$0xff]  ;;  %v840_v45 = vld [vmem:[#allocation5 + $0xe28] sm:$0xff] }
 0x109   :  { %895 = vmatpush.msrb.mxu1 %v859_v48  ;;  %878 = vmatpush.msrb.mxu0 %v821_v54  ;;  %v720_v48 = vperm.slane %v1758_v6, 2 }
 0x10a   :  { %935 = vmatpush.msrb.mxu3 %v860_v49  ;;  %918 = vmatpush.msrb.mxu2 %v822_v55 }
 0x10b   :  { %896 = vmatpush.msrb.mxu1 %v857_v52  ;;  %879 = vmatpush.msrb.mxu0 %v819_v59 }
 0x10c   :  { %936 = vmatpush.msrb.mxu3 %v858_v53  ;;  %919 = vmatpush.msrb.mxu2 %v820_v60  ;;  %v721_v53 = vperm.slane %v1761_v14, 2  ;;  %v1020_v60 = vld [vmem:[#allocation5 + $0x11e0] sm:$0xff] }
 0x10d   :  { %897 = vmatpush.msrb.mxu1 %v855_v57  ;;  %880 = vmatpush.msrb.mxu0 %v817_v62  ;;  %v1018_v62 = vld [vmem:[#allocation5 + $0x11c0] sm:$0xff] }
 0x10e   :  { %937 = vmatpush.msrb.mxu3 %v856_v58  ;;  %920 = vmatpush.msrb.mxu2 %v818_v63  ;;  %v1019_v63 = vld [vmem:[#allocation5 + $0x11c8] sm:$0xff] }
 0x10f   :  { %881 = vmatpush.msrb.mxu0 %v815_v18  ;;  %898 = vmatpush.msrb.mxu1 %v853_v19  ;;  %v1009_v18 = vld [vmem:[#allocation5 + $0x1128] sm:$0xff] }
 0x110   :  { %921 = vmatpush.msrb.mxu2 %v816_v20  ;;  %938 = vmatpush.msrb.mxu3 %v854_v21  ;;  %v1047_v19 = vld [vmem:[#allocation5 + $0x1388] sm:$0xff]  ;;  %v1006_v20 = vld [vmem:[#allocation5 + $0x1100] sm:$0xff] }
 0x111   :  { %882 = vmatpush.msrb.mxu0 %v813_v22  ;;  %899 = vmatpush.msrb.mxu1 %v851_v23  ;;  %v1044_v21 = vld [vmem:[#allocation5 + $0x1360] sm:$0xff]  ;;  %v1007_v22 = vld [vmem:[#allocation5 + $0x1108] sm:$0xff] }
 0x112   :  { %922 = vmatpush.msrb.mxu2 %v814_v24  ;;  %939 = vmatpush.msrb.mxu3 %v852_v25  ;;  %v1045_v23 = vld [vmem:[#allocation5 + $0x1368] sm:$0xff]  ;;  %v1004_v24 = vld [vmem:[#allocation5 + $0x10e0] sm:$0xff] }
 0x113   :  { %883 = vmatpush.msrb.mxu0 %v811_v26  ;;  %900 = vmatpush.msrb.mxu1 %v849_v27  ;;  %v1042_v25 = vld [vmem:[#allocation5 + $0x1340] sm:$0xff]  ;;  %v1005_v26 = vld [vmem:[#allocation5 + $0x10e8] sm:$0xff] }
 0x114   :  { %923 = vmatpush.msrb.mxu2 %v812_v28  ;;  %940 = vmatpush.msrb.mxu3 %v850_v29  ;;  %v1043_v27 = vld [vmem:[#allocation5 + $0x1348] sm:$0xff]  ;;  %v1002_v28 = vld [vmem:[#allocation5 + $0x10c0] sm:$0xff] }
 0x115   :  { %884 = vmatpush.msrb.mxu0 %v809_v30  ;;  %901 = vmatpush.msrb.mxu1 %v847_v31  ;;  %v1040_v29 = vld [vmem:[#allocation5 + $0x1320] sm:$0xff]  ;;  %v1003_v30 = vld [vmem:[#allocation5 + $0x10c8] sm:$0xff] }
 0x116   :  { %924 = vmatpush.msrb.mxu2 %v810_v32  ;;  %941 = vmatpush.msrb.mxu3 %v848_v33  ;;  %v1041_v31 = vld [vmem:[#allocation5 + $0x1328] sm:$0xff]  ;;  %v1000_v32 = vld [vmem:[#allocation5 + $0x10a0] sm:$0xff] }
 0x117   :  { %885 = vmatpush.msrb.mxu0 %v807_v34  ;;  %902 = vmatpush.msrb.mxu1 %v845_v35  ;;  %v1038_v33 = vld [vmem:[#allocation5 + $0x1300] sm:$0xff]  ;;  %v1001_v34 = vld [vmem:[#allocation5 + $0x10a8] sm:$0xff] }
 0x118   :  { %925 = vmatpush.msrb.mxu2 %v808_v36  ;;  %942 = vmatpush.msrb.mxu3 %v846_v37  ;;  %v1039_v35 = vld [vmem:[#allocation5 + $0x1308] sm:$0xff]  ;;  %v998_v36 = vld [vmem:[#allocation5 + $0x1080] sm:$0xff] }
 0x119   :  { %886 = vmatpush.msrb.mxu0 %v805_v38  ;;  %903 = vmatpush.msrb.mxu1 %v843_v39  ;;  %v1036_v37 = vld [vmem:[#allocation5 + $0x12e0] sm:$0xff]  ;;  %v999_v38 = vld [vmem:[#allocation5 + $0x1088] sm:$0xff] }
 0x11a   :  { %926 = vmatpush.msrb.mxu2 %v806_v40  ;;  %943 = vmatpush.msrb.mxu3 %v844_v41  ;;  %v1037_v39 = vld [vmem:[#allocation5 + $0x12e8] sm:$0xff]  ;;  %v996_v40 = vld [vmem:[#allocation5 + $0x1060] sm:$0xff] }
 0x11b   :  { %v1034_v41 = vld [vmem:[#allocation5 + $0x12c0] sm:$0xff] }
 0x11c   :  { %944 = vmatpush.msrb.mxu3 %v842_v43  ;;  %v1035_v43 = vld [vmem:[#allocation5 + $0x12c8] sm:$0xff] }
 0x11e   :  { %945 = vmatpush.msrb.mxu3 %v840_v45  ;;  %v1032_v45 = vld [vmem:[#allocation5 + $0x12a0] sm:$0xff] }
 0x154   :  { %v504_v42 = vpop.f32.mrf.mxu0 }
 0x15a   :  { %v544_v56 = vpop.f32.mrf.mxu2 }
 0x15b   :  { %v524_v47 = vpop.f32.mrf.mxu1 }
 0x15c   :  { %v584_v0 = vpop.f32.mrf.mxu0  ;;  %v525_v2 = vadd.f32 %v524_v47, %v504_v42  ;;  %v841_v42 = vld [vmem:[#allocation5 + $0xe40] sm:$0xff]  ;;  %v838_v47 = vld [vmem:[#allocation5 + $0xe08] sm:$0xff] }
 0x15d   :  { %904 = vmatpush.msrb.mxu1 %v841_v42  ;;  %946 = vmatpush.msrb.mxu3 %v838_v47  ;;  %v997_v42 = vld [vmem:[#allocation5 + $0x1068] sm:$0xff] }
 0x15e   :  { %v1033_v47 = vld [vmem:[#allocation5 + $0x12a8] sm:$0xff] }
 0x15f   :  { %905 = vmatpush.msrb.mxu1 %v839_v44  ;;  %v994_v44 = vld [vmem:[#allocation5 + $0x1040] sm:$0xff] }
 0x161   :  { %v564_v61 = vpop.f32.mrf.mxu3  ;;  %906 = vmatpush.msrb.mxu1 %v837_v46  ;;  %v995_v46 = vld [vmem:[#allocation5 + $0x1048] sm:$0xff] }
 0x162   :  { %v624_v8 = vpop.f32.mrf.mxu2  ;;  %v565_v10 = vadd.f32 %v564_v61, %v544_v56  ;;  %v1021_v61 = vld [vmem:[#allocation5 + $0x11e8] sm:$0xff] }
 0x163   :  { %v604_v1 = vpop.f32.mrf.mxu1 }
 0x164   :  { %v605_v3 = vadd.f32 %v604_v1, %v584_v0  ;;  %v1016_v0 = vld [vmem:[#allocation5 + $0x11a0] sm:$0xff]  ;;  %v1017_v1 = vld [vmem:[#allocation5 + $0x11a8] sm:$0xff] }
 0x166   :  { %v647_v5 = vmax.f32 %v525_v2, %v605_v3  ;;  %v1014_v2 = vld [vmem:[#allocation5 + $0x1180] sm:$0xff] }
 0x167   :  { %v1052_v3 = vld [vmem:[#allocation5 + $0x13e0] sm:$0xff] }
 0x168   :  { %v651_v7 = vadd.f32 %v649_v4, %v647_v5  ;;  %v1015_v4 = vld [vmem:[#allocation5 + $0x1188] sm:$0xff] }
 0x169   :  { %v644_v9 = vpop.f32.mrf.mxu3  ;;  %v1053_v5 = vld [vmem:[#allocation5 + $0x13e8] sm:$0xff] }
 0x16a   :  { %v653_v11 = vmax.f32 %v651_v7, 0.0  ;;  %v645_v12 = vadd.f32 %v644_v9, %v624_v8  ;;  %v1012_v7 = vld [vmem:[#allocation5 + $0x1160] sm:$0xff]  ;;  %v1013_v9 = vld [vmem:[#allocation5 + $0x1168] sm:$0xff] }
 0x16b   :  { %v1050_v8 = vld [vmem:[#allocation5 + $0x13c0] sm:$0xff] }
 0x16c   :  { %v648_v15 = vmax.f32 %v565_v10, %v645_v12  ;;  %738 = vmatmul.f32.vlgmr.msra.gmra.mxu0 %v653_v11  ;;  %778 = vmatmul.f32.vlgmr.msra.gmra.mxu2 %v653_v11  ;;  %v1051_v10 = vld [vmem:[#allocation5 + $0x13c8] sm:$0xff]  ;;  %v1010_v11 = vld [vmem:[#allocation5 + $0x1140] sm:$0xff] }
 0x16d   :  { %1056 = vmatpush.msra.mxu0 %v1020_v60  ;;  %1096 = vmatpush.msra.mxu2 %v1021_v61  ;;  %v1048_v12 = vld [vmem:[#allocation5 + $0x13a0] sm:$0xff]  ;;  %v870_v60 = vperm.slane %v1761_v14, 3 }
 0x16e   :  { %v652_v16 = vadd.f32 %v650_v13, %v648_v15  ;;  %v1011_v13 = vld [vmem:[#allocation5 + $0x1148] sm:$0xff]  ;;  %v1026_v61 = vld [vmem:[#allocation5 + $0x1240] sm:$0xff] }
 0x16f   :  { %1057 = vmatpush.msra.mxu0 %v1018_v62  ;;  %1097 = vmatpush.msra.mxu2 %v1019_v63  ;;  %v1049_v15 = vld [vmem:[#allocation5 + $0x13a8] sm:$0xff]  ;;  %v1024_v63 = vld [vmem:[#allocation5 + $0x1220] sm:$0xff] }
 0x170   :  { %v654_v17 = vmax.f32 %v652_v16, 0.0  ;;  %v1008_v16 = vld [vmem:[#allocation5 + $0x1120] sm:$0xff]  ;;  %v1027_v62 = vld [vmem:[#allocation5 + $0x1248] sm:$0xff] }
 0x171   :  { %1058 = vmatpush.msra.mxu0 %v1016_v0  ;;  %1098 = vmatpush.msra.mxu2 %v1017_v1  ;;  %v1025_v1 = vld [vmem:[#allocation5 + $0x1228] sm:$0xff] }
 0x172   :  { %758 = vmatmul.f32.vlgmr.msra.gmra.mxu1 %v654_v17  ;;  %798 = vmatmul.f32.vlgmr.msra.gmra.mxu3 %v654_v17  ;;  %v1046_v17 = vld [vmem:[#allocation5 + $0x1380] sm:$0xff] }
 0x173   :  { %1059 = vmatpush.msra.mxu0 %v1014_v2  ;;  %1076 = vmatpush.msra.mxu1 %v1052_v3  ;;  %v1022_v3 = vld [vmem:[#allocation5 + $0x1200] sm:$0xff] }
 0x174   :  { %1099 = vmatpush.msra.mxu2 %v1015_v4  ;;  %1116 = vmatpush.msra.mxu3 %v1053_v5  ;;  %v1023_v4 = vld [vmem:[#allocation5 + $0x1208] sm:$0xff] }
 0x175   :  { %1060 = vmatpush.msra.mxu0 %v1012_v7  ;;  %1077 = vmatpush.msra.mxu1 %v1050_v8 }
 0x176   :  { %1100 = vmatpush.msra.mxu2 %v1013_v9  ;;  %1117 = vmatpush.msra.mxu3 %v1051_v10  ;;  %v1169_v9 = vld [vmem:[#allocation5 + $0x15e0] sm:$0xff]  ;;  %v1170_v10 = vld [vmem:[#allocation5 + $0x15e8] sm:$0xff] }
 0x177   :  { %1061 = vmatpush.msra.mxu0 %v1010_v11  ;;  %1078 = vmatpush.msra.mxu1 %v1048_v12  ;;  %v1167_v11 = vld [vmem:[#allocation5 + $0x15c0] sm:$0xff]  ;;  %v1168_v12 = vld [vmem:[#allocation5 + $0x15c8] sm:$0xff] }
 0x178   :  { %1101 = vmatpush.msra.mxu2 %v1011_v13  ;;  %1118 = vmatpush.msra.mxu3 %v1049_v15  ;;  %v1165_v15 = vld [vmem:[#allocation5 + $0x15a0] sm:$0xff] }
 0x179   :  { %1062 = vmatpush.msra.mxu0 %v1008_v16  ;;  %1079 = vmatpush.msra.mxu1 %v1046_v17  ;;  %v1166_v16 = vld [vmem:[#allocation5 + $0x15a8] sm:$0xff]  ;;  %v1201_v17 = vld [vmem:[#allocation5 + $0x17e0] sm:$0xff] }
 0x17a   :  { %1102 = vmatpush.msra.mxu2 %v1009_v18  ;;  %1119 = vmatpush.msra.mxu3 %v1047_v19  ;;  %v1202_v18 = vld [vmem:[#allocation5 + $0x17e8] sm:$0xff]  ;;  %v1199_v19 = vld [vmem:[#allocation5 + $0x17c0] sm:$0xff] }
 0x17b   :  { %1063 = vmatpush.msra.mxu0 %v1006_v20  ;;  %1080 = vmatpush.msra.mxu1 %v1044_v21  ;;  %v1163_v21 = vld [vmem:[#allocation5 + $0x1580] sm:$0xff] }
 0x17c   :  { %1103 = vmatpush.msra.mxu2 %v1007_v22  ;;  %1120 = vmatpush.msra.mxu3 %v1045_v23  ;;  %v1164_v22 = vld [vmem:[#allocation5 + $0x1588] sm:$0xff] }
 0x17d   :  { %1064 = vmatpush.msra.mxu0 %v1004_v24  ;;  %1081 = vmatpush.msra.mxu1 %v1042_v25  ;;  %v1200_v23 = vld [vmem:[#allocation5 + $0x17c8] sm:$0xff]  ;;  %v1197_v24 = vld [vmem:[#allocation5 + $0x17a0] sm:$0xff] }
 0x17e   :  { %1104 = vmatpush.msra.mxu2 %v1005_v26  ;;  %1121 = vmatpush.msra.mxu3 %v1043_v27  ;;  %v1198_v25 = vld [vmem:[#allocation5 + $0x17a8] sm:$0xff]  ;;  %v1161_v27 = vld [vmem:[#allocation5 + $0x1560] sm:$0xff] }
 0x17f   :  { %1065 = vmatpush.msra.mxu0 %v1002_v28  ;;  %1082 = vmatpush.msra.mxu1 %v1040_v29  ;;  %v1162_v28 = vld [vmem:[#allocation5 + $0x1568] sm:$0xff] }
 0x180   :  { %1105 = vmatpush.msra.mxu2 %v1003_v30  ;;  %1122 = vmatpush.msra.mxu3 %v1041_v31  ;;  %v1195_v30 = vld [vmem:[#allocation5 + $0x1780] sm:$0xff]  ;;  %v1196_v31 = vld [vmem:[#allocation5 + $0x1788] sm:$0xff] }
 0x181   :  { %1066 = vmatpush.msra.mxu0 %v1000_v32  ;;  %1083 = vmatpush.msra.mxu1 %v1038_v33  ;;  %v1159_v32 = vld [vmem:[#allocation5 + $0x1540] sm:$0xff]  ;;  %v1160_v33 = vld [vmem:[#allocation5 + $0x1548] sm:$0xff] }
 0x182   :  { %1106 = vmatpush.msra.mxu2 %v1001_v34  ;;  %1123 = vmatpush.msra.mxu3 %v1039_v35  ;;  %v1193_v34 = vld [vmem:[#allocation5 + $0x1760] sm:$0xff]  ;;  %v1194_v35 = vld [vmem:[#allocation5 + $0x1768] sm:$0xff] }
 0x183   :  { %1067 = vmatpush.msra.mxu0 %v998_v36  ;;  %1084 = vmatpush.msra.mxu1 %v1036_v37  ;;  %v1157_v36 = vld [vmem:[#allocation5 + $0x1520] sm:$0xff]  ;;  %v1158_v37 = vld [vmem:[#allocation5 + $0x1528] sm:$0xff] }
 0x184   :  { %1107 = vmatpush.msra.mxu2 %v999_v38  ;;  %1124 = vmatpush.msra.mxu3 %v1037_v39  ;;  %v1191_v38 = vld [vmem:[#allocation5 + $0x1740] sm:$0xff]  ;;  %v1192_v39 = vld [vmem:[#allocation5 + $0x1748] sm:$0xff] }
 0x185   :  { %1068 = vmatpush.msra.mxu0 %v996_v40  ;;  %1085 = vmatpush.msra.mxu1 %v1034_v41  ;;  %v1155_v41 = vld [vmem:[#allocation5 + $0x1500] sm:$0xff] }
 0x186   :  { %1108 = vmatpush.msra.mxu2 %v997_v42  ;;  %1125 = vmatpush.msra.mxu3 %v1035_v43  ;;  %v1156_v42 = vld [vmem:[#allocation5 + $0x1508] sm:$0xff] }
 0x187   :  { %1069 = vmatpush.msra.mxu0 %v994_v44  ;;  %1086 = vmatpush.msra.mxu1 %v1032_v45  ;;  %v1189_v44 = vld [vmem:[#allocation5 + $0x1720] sm:$0xff]  ;;  %v1190_v45 = vld [vmem:[#allocation5 + $0x1728] sm:$0xff] }
 0x188   :  { %1109 = vmatpush.msra.mxu2 %v995_v46  ;;  %1126 = vmatpush.msra.mxu3 %v1033_v47  ;;  %v1153_v46 = vld [vmem:[#allocation5 + $0x14e0] sm:$0xff]  ;;  %v1154_v47 = vld [vmem:[#allocation5 + $0x14e8] sm:$0xff] }
 0x1e9   :  { %v739_v49 = vpop.f32.mrf.mxu0 }
 0x1ea   :  { %v740_v50 = vadd.f32 %v739_v49, %v720_v48  ;;  %v869_v48 = vperm.slane %v1758_v6, 3  ;;  %v992_v49 = vld [vmem:[#allocation5 + $0x1020] sm:$0xff] }
 0x1eb   :  { %1070 = vmatpush.msra.mxu0 %v992_v49 }
 0x1ef   :  { %v759_v51 = vpop.f32.mrf.mxu1  ;;  %v779_v54 = vpop.f32.mrf.mxu2 }
 0x1f0   :  { %v760_v52 = vadd.f32 %v759_v51, %v740_v50  ;;  %v780_v56 = vadd.f32 %v779_v54, %v721_v53  ;;  %v1030_v50 = vld [vmem:[#allocation5 + $0x1280] sm:$0xff]  ;;  %v1031_v53 = vld [vmem:[#allocation5 + $0x1288] sm:$0xff] }
 0x1f1   :  { %v990_v54 = vld [vmem:[#allocation5 + $0x1000] sm:$0xff]  ;;  %1087 = vmatpush.msra.mxu1 %v1030_v50  ;;  %1127 = vmatpush.msra.mxu3 %v1031_v53 }
 0x1f2   :  { %v802_v55 = vmax.f32 %v760_v52, 0.0  ;;  %v993_v52 = vld [vmem:[#allocation5 + $0x1028] sm:$0xff]  ;;  %1071 = vmatpush.msra.mxu0 %v990_v54  ;;  %v1151_v50 = vld [vmem:[#allocation5 + $0x14c0] sm:$0xff] }
 0x1f3   :  { %1110 = vmatpush.msra.mxu2 %v993_v52 }
 0x1f4   :  { %887 = vmatmul.f32.vlgmr.msrb.gmra.mxu0 %v802_v55  ;;  %927 = vmatmul.f32.vlgmr.msrb.gmra.mxu2 %v802_v55  ;;  %v1028_v55 = vld [vmem:[#allocation5 + $0x1260] sm:$0xff] }
 0x1f5   :  { %v799_v57 = vpop.f32.mrf.mxu3  ;;  %1088 = vmatpush.msra.mxu1 %v1028_v55  ;;  %1205 = vmatpush.msrb.mxu0 %v1169_v9  ;;  %v1147_v9 = vld [vmem:[#allocation5 + $0x1480] sm:$0xff] }
 0x1f6   :  { %v800_v58 = vadd.f32 %v799_v57, %v780_v56  ;;  %v991_v56 = vld [vmem:[#allocation5 + $0x1008] sm:$0xff] }
 0x1f7   :  { %v1029_v57 = vld [vmem:[#allocation5 + $0x1268] sm:$0xff]  ;;  %1111 = vmatpush.msra.mxu2 %v991_v56  ;;  %1089 = vmatpush.msra.mxu1 %v1026_v61 }
 0x1f8   :  { %v803_v59 = vmax.f32 %v800_v58, 0.0  ;;  %1128 = vmatpush.msra.mxu3 %v1029_v57  ;;  %1206 = vmatpush.msrb.mxu0 %v1167_v11  ;;  %v1148_v11 = vld [vmem:[#allocation5 + $0x1488] sm:$0xff] }
 0x1f9   :  { %1090 = vmatpush.msra.mxu1 %v1024_v63  ;;  %1245 = vmatpush.msrb.mxu2 %v1170_v10  ;;  %v1185_v10 = vld [vmem:[#allocation5 + $0x16e0] sm:$0xff] }
 0x1fa   :  { %907 = vmatmul.f32.vlgmr.msrb.gmra.mxu1 %v803_v59  ;;  %947 = vmatmul.f32.vlgmr.msrb.gmra.mxu3 %v803_v59 }
 0x1fb   :  { %1129 = vmatpush.msra.mxu3 %v1027_v62  ;;  %1091 = vmatpush.msra.mxu1 %v1022_v3 }
 0x1fc   :  { %1246 = vmatpush.msrb.mxu2 %v1168_v12  ;;  %1207 = vmatpush.msrb.mxu0 %v1165_v15  ;;  %v1186_v12 = vld [vmem:[#allocation5 + $0x16e8] sm:$0xff]  ;;  %v1183_v15 = vld [vmem:[#allocation5 + $0x16c0] sm:$0xff] }
 0x1fd   :  { %1130 = vmatpush.msra.mxu3 %v1025_v1  ;;  %1225 = vmatpush.msrb.mxu1 %v1201_v17  ;;  %v1184_v17 = vld [vmem:[#allocation5 + $0x16c8] sm:$0xff] }
 0x1fe   :  { %1247 = vmatpush.msrb.mxu2 %v1166_v16  ;;  %1208 = vmatpush.msrb.mxu0 %v1163_v21  ;;  %v1146_v16 = vld [vmem:[#allocation5 + $0x1468] sm:$0xff] }
 0x1ff   :  { %1131 = vmatpush.msra.mxu3 %v1023_v4  ;;  %1226 = vmatpush.msrb.mxu1 %v1199_v19  ;;  %v1181_v19 = vld [vmem:[#allocation5 + $0x16a0] sm:$0xff]  ;;  %v1182_v21 = vld [vmem:[#allocation5 + $0x16a8] sm:$0xff] }
 0x200   :  { %1248 = vmatpush.msrb.mxu2 %v1164_v22  ;;  %1209 = vmatpush.msrb.mxu0 %v1161_v27  ;;  %v1141_v22 = vld [vmem:[#allocation5 + $0x1420] sm:$0xff] }
 0x201   :  { %1265 = vmatpush.msrb.mxu3 %v1202_v18  ;;  %1227 = vmatpush.msrb.mxu1 %v1197_v24  ;;  %v1143_v18 = vld [vmem:[#allocation5 + $0x1440] sm:$0xff]  ;;  %v1142_v24 = vld [vmem:[#allocation5 + $0x1428] sm:$0xff] }
 0x202   :  { %1249 = vmatpush.msrb.mxu2 %v1162_v28  ;;  %1210 = vmatpush.msrb.mxu0 %v1159_v32  ;;  %v1177_v27 = vld [vmem:[#allocation5 + $0x1660] sm:$0xff]  ;;  %v1140_v28 = vld [vmem:[#allocation5 + $0x1408] sm:$0xff] }
 0x203   :  { %1266 = vmatpush.msrb.mxu3 %v1200_v23  ;;  %1228 = vmatpush.msrb.mxu1 %v1195_v30  ;;  %v1179_v23 = vld [vmem:[#allocation5 + $0x1680] sm:$0xff] }
 0x204   :  { %1250 = vmatpush.msrb.mxu2 %v1160_v33  ;;  %1211 = vmatpush.msrb.mxu0 %v1157_v36  ;;  %v1175_v30 = vld [vmem:[#allocation5 + $0x1640] sm:$0xff]  ;;  %v1174_v33 = vld [vmem:[#allocation5 + $0x1628] sm:$0xff] }
 0x205   :  { %1267 = vmatpush.msrb.mxu3 %v1198_v25  ;;  %1229 = vmatpush.msrb.mxu1 %v1193_v34  ;;  %v1180_v25 = vld [vmem:[#allocation5 + $0x1688] sm:$0xff]  ;;  %v1173_v32 = vld [vmem:[#allocation5 + $0x1620] sm:$0xff] }
 0x206   :  { %1251 = vmatpush.msrb.mxu2 %v1158_v37  ;;  %1212 = vmatpush.msrb.mxu0 %v1155_v41  ;;  %v1171_v34 = vld [vmem:[#allocation5 + $0x1600] sm:$0xff]  ;;  %v1319_v37 = vld [vmem:[#allocation5 + $0x19e8] sm:$0xff] }
 0x207   :  { %1268 = vmatpush.msrb.mxu3 %v1196_v31  ;;  %1230 = vmatpush.msrb.mxu1 %v1191_v38  ;;  %v1176_v31 = vld [vmem:[#allocation5 + $0x1648] sm:$0xff]  ;;  %v1318_v36 = vld [vmem:[#allocation5 + $0x19e0] sm:$0xff] }
 0x208   :  { %1252 = vmatpush.msrb.mxu2 %v1156_v42  ;;  %1213 = vmatpush.msrb.mxu0 %v1153_v46  ;;  %v1316_v38 = vld [vmem:[#allocation5 + $0x19c0] sm:$0xff]  ;;  %v1315_v41 = vld [vmem:[#allocation5 + $0x19a8] sm:$0xff] }
 0x209   :  { %1269 = vmatpush.msrb.mxu3 %v1194_v35  ;;  %1231 = vmatpush.msrb.mxu1 %v1189_v44  ;;  %v1172_v35 = vld [vmem:[#allocation5 + $0x1608] sm:$0xff]  ;;  %v1350_v42 = vld [vmem:[#allocation5 + $0x1be0] sm:$0xff] }
 0x20a   :  { %1253 = vmatpush.msrb.mxu2 %v1154_v47  ;;  %1214 = vmatpush.msrb.mxu0 %v1151_v50  ;;  %v1348_v44 = vld [vmem:[#allocation5 + $0x1bc0] sm:$0xff]  ;;  %v1313_v46 = vld [vmem:[#allocation5 + $0x1988] sm:$0xff] }
 0x20b   :  { %1270 = vmatpush.msrb.mxu3 %v1192_v39  ;;  %v1317_v39 = vld [vmem:[#allocation5 + $0x19c8] sm:$0xff]  ;;  %v1310_v50 = vld [vmem:[#allocation5 + $0x1960] sm:$0xff] }
 0x20c   :  { %v1349_v47 = vld [vmem:[#allocation5 + $0x1bc8] sm:$0xff] }
 0x20d   :  { %1271 = vmatpush.msrb.mxu3 %v1190_v45  ;;  %v1312_v45 = vld [vmem:[#allocation5 + $0x1980] sm:$0xff] }
 0x271   :  { %v888_v51 = vpop.f32.mrf.mxu0 }
 0x272   :  { %v889_v58 = vadd.f32 %v888_v51, %v869_v48  ;;  %v1152_v51 = vld [vmem:[#allocation5 + $0x14c8] sm:$0xff] }
 0x273   :  { %1254 = vmatpush.msrb.mxu2 %v1152_v51  ;;  %v1311_v51 = vld [vmem:[#allocation5 + $0x1968] sm:$0xff] }
 0x277   :  { %v908_v6 = vpop.f32.mrf.mxu1  ;;  %v928_v0 = vpop.f32.mrf.mxu2 }
 0x278   :  { %v909_v59 = vadd.f32 %v908_v6, %v889_v58  ;;  %v929_v7 = vadd.f32 %v928_v0, %v870_v60 }
 0x27a   :  { %v951_v2 = vsub.f32 0.0, %v909_v59 }
 0x27c   :  { %v953_v5 = vmul.f32 1.442695, %v951_v2 }
 0x27d   :  { %v948_v8 = vpop.f32.mrf.mxu3 }
 0x27e   :  { %1611 = vpow2.f32 %v953_v5  ;;  %v949_v14 = vadd.f32 %v948_v8, %v929_v7  ;;  %v1149_v5 = vld [vmem:[#allocation5 + $0x14a0] sm:$0xff]  ;;  %v1150_v8 = vld [vmem:[#allocation5 + $0x14a8] sm:$0xff] }
 0x27f   :  { %v1187_v7 = vld [vmem:[#allocation5 + $0x1700] sm:$0xff]  ;;  %1215 = vmatpush.msrb.mxu0 %v1149_v5  ;;  %1255 = vmatpush.msrb.mxu2 %v1150_v8 }
 0x280   :  { %v952_v13 = vsub.f32 0.0, %v949_v14  ;;  %1232 = vmatpush.msrb.mxu1 %v1187_v7  ;;  %v1188_v14 = vld [vmem:[#allocation5 + $0x1708] sm:$0xff]  ;;  %v1300_v5 = vld [vmem:[#allocation5 + $0x18c0] sm:$0xff] }
 0x281   :  { %1272 = vmatpush.msrb.mxu3 %v1188_v14  ;;  %1216 = vmatpush.msrb.mxu0 %v1147_v9  ;;  %v1301_v7 = vld [vmem:[#allocation5 + $0x18c8] sm:$0xff] }
 0x282   :  { %v955_v20 = vmul.f32 1.442695, %v952_v13  ;;  %1233 = vmatpush.msrb.mxu1 %v1185_v10  ;;  %v1145_v13 = vld [vmem:[#allocation5 + $0x1460] sm:$0xff]  ;;  %1256 = vmatpush.msrb.mxu2 %v1148_v11  ;;  %v1773_v11 = vld [vmem:[#allocation7 + $0x8] sm:$0xff] }
 0x283   :  { %1273 = vmatpush.msrb.mxu3 %v1186_v12  ;;  %1217 = vmatpush.msrb.mxu0 %v1145_v13  ;;  %v1055_v12 = vperm.slane %v1773_v11, 4 }
 0x284   :  { %v1612_v26 = vpop.eup %1611  ;;  %1613 = vpow2.f32 %v955_v20  ;;  %1234 = vmatpush.msrb.mxu1 %v1183_v15  ;;  %1257 = vmatpush.msrb.mxu2 %v1146_v16  ;;  %v1144_v20 = vld [vmem:[#allocation5 + $0x1448] sm:$0xff] }
 0x285   :  { %v957_v29 = vadd.f32 1.0, %v1612_v26  ;;  %1274 = vmatpush.msrb.mxu3 %v1184_v17  ;;  %1218 = vmatpush.msrb.mxu0 %v1143_v18  ;;  %v1139_v26 = vld [vmem:[#allocation5 + $0x1400] sm:$0xff] }
 0x286   :  { %1235 = vmatpush.msrb.mxu1 %v1181_v19  ;;  %1258 = vmatpush.msrb.mxu2 %v1144_v20  ;;  %v1298_v20 = vld [vmem:[#allocation5 + $0x18a0] sm:$0xff] }
 0x287   :  { %1615 = vrcp.f32 %v957_v29  ;;  %v970_v53 = vand.u32 2147483648, %v957_v29  ;;  %v968_v55 = vand.u32 2147483647, %v957_v29  ;;  %vm964_vm1 = vweird.f32 %v957_v29  ;;  %1275 = vmatpush.msrb.mxu3 %v1182_v21  ;;  %1219 = vmatpush.msrb.mxu0 %v1141_v22  ;;  %v1336_v21 = vld [vmem:[#allocation5 + $0x1b00] sm:$0xff]  ;;  %v1299_v22 = vld [vmem:[#allocation5 + $0x18a8] sm:$0xff] }
 0x288   :  { %1236 = vmatpush.msrb.mxu1 %v1179_v23  ;;  %1259 = vmatpush.msrb.mxu2 %v1142_v24  ;;  %v1337_v23 = vld [vmem:[#allocation5 + $0x1b08] sm:$0xff]  ;;  %v1296_v24 = vld [vmem:[#allocation5 + $0x1880] sm:$0xff] }
 0x289   :  { %v971_v6 = vor.u32 1.1754944e-38, %v970_v53  ;;  %vm969_vm3 = vcmp.eq.f32.partialorder %v968_v55, 8.507059e+37  ;;  %1276 = vmatpush.msrb.mxu3 %v1180_v25  ;;  %1220 = vmatpush.msrb.mxu0 %v1139_v26  ;;  %v1345_v53 = vld [vmem:[#allocation5 + $0x1b88] sm:$0xff]  ;;  %v1334_v25 = vld [vmem:[#allocation5 + $0x1ae0] sm:$0xff] }
 0x28a   :  { %v1614_v40 = vpop.eup %1613  ;;  %1237 = vmatpush.msrb.mxu1 %v1177_v27  ;;  %1260 = vmatpush.msrb.mxu2 %v1140_v28  ;;  %v1309_v55 = vld [vmem:[#allocation5 + $0x1948] sm:$0xff]  ;;  %v1294_v28 = vld [vmem:[#allocation5 + $0x1860] sm:$0xff] }
 0x28b   :  { %v958_v43 = vadd.f32 1.0, %v1614_v40  ;;  %v1314_v40 = vld [vmem:[#allocation5 + $0x19a0] sm:$0xff]  ;;  %v1297_v26 = vld [vmem:[#allocation5 + $0x1888] sm:$0xff] }
 0x28c   :  { %1238 = vmatpush.msrb.mxu1 %v1175_v30  ;;  %v1335_v27 = vld [vmem:[#allocation5 + $0x1ae8] sm:$0xff] }
 0x28d   :  { %v1616_v48 = vpop.eup %1615  ;;  %1617 = vrcp.f32 %v958_v43  ;;  %v985_v62 = vand.u32 2147483648, %v958_v43  ;;  %v983_v0 = vand.u32 2147483647, %v958_v43  ;;  %vm979_vm5 = vweird.f32 %v958_v43  ;;  %v1295_v30 = vld [vmem:[#allocation5 + $0x1868] sm:$0xff] }
 0x28e   :  { %v960_v49 = vmul.f32 %v1616_v48, %v957_v29  ;;  %vm965_vm0 = vweird.f32 %v1616_v48  ;;  %v1178_v29 = vld [vmem:[#allocation5 + $0x1668] sm:$0xff]  ;;  %1239 = vmatpush.msrb.mxu1 %v1173_v32  ;;  %v1292_v32 = vld [vmem:[#allocation5 + $0x1840] sm:$0xff] }
 0x28f   :  { %vm966_vm2 = vmor %vm964_vm1, %vm965_vm0  ;;  %v986_v2 = vor.u32 1.1754944e-38, %v985_v62  ;;  %vm984_vm7 = vcmp.eq.f32.partialorder %v983_v0, 8.507059e+37  ;;  %1277 = vmatpush.msrb.mxu3 %v1178_v29  ;;  %v1305_v62 = vld [vmem:[#allocation5 + $0x1908] sm:$0xff]  ;;  %v1332_v29 = vld [vmem:[#allocation5 + $0x1ac0] sm:$0xff] }
 0x290   :  { %v961_v52 = vsub.f32 1.0, %v960_v49  ;;  %1240 = vmatpush.msrb.mxu1 %v1171_v34  ;;  %v1347_v49 = vld [vmem:[#allocation5 + $0x1ba8] sm:$0xff] }
 0x291   :  { %1278 = vmatpush.msrb.mxu3 %v1176_v31  ;;  %v1339_v0 = vld [vmem:[#allocation5 + $0x1b28] sm:$0xff] }
 0x292   :  { %v962_v54 = vmul.f32 %v1616_v48, %v961_v52  ;;  %v1344_v52 = vld [vmem:[#allocation5 + $0x1b80] sm:$0xff]  ;;  %v1333_v31 = vld [vmem:[#allocation5 + $0x1ac8] sm:$0xff] }
 0x293   :  { %v1618_v56 = vpop.eup %1617  ;;  %1279 = vmatpush.msrb.mxu3 %v1174_v33  ;;  %v1330_v33 = vld [vmem:[#allocation5 + $0x1aa0] sm:$0xff]  ;;  %v1293_v34 = vld [vmem:[#allocation5 + $0x1848] sm:$0xff] }
 0x294   :  { %v963_v57 = vadd.f32 %v1616_v48, %v962_v54  ;;  %v975_v58 = vmul.f32 %v1618_v56, %v958_v43  ;;  %vm980_vm4 = vweird.f32 %v1618_v56  ;;  %v1351_v43 = vld [vmem:[#allocation5 + $0x1be8] sm:$0xff]  ;;  %v1308_v54 = vld [vmem:[#allocation5 + $0x1940] sm:$0xff] }
 0x295   :  { %vm981_vm6 = vmor %vm979_vm5, %vm980_vm4  ;;  %1280 = vmatpush.msrb.mxu3 %v1172_v35  ;;  %v1331_v35 = vld [vmem:[#allocation5 + $0x1aa8] sm:$0xff] }
 0x296   :  { %v967_v59 = vsel %vm966_vm2, %v1616_v48, %v963_v57  ;;  %v976_v60 = vsub.f32 1.0, %v975_v58  ;;  %v1346_v48 = vld [vmem:[#allocation5 + $0x1ba0] sm:$0xff]  ;;  %v1343_v57 = vld [vmem:[#allocation5 + $0x1b68] sm:$0xff] }
 0x297   :  { %v972_v61 = vsel %vm969_vm3, %v971_v6, %v967_v59  ;;  %v1306_v58 = vld [vmem:[#allocation5 + $0x1920] sm:$0xff]  ;;  %v1307_v6 = vld [vmem:[#allocation5 + $0x1928] sm:$0xff] }
 0x298   :  { %1072 = vmatmul.f32.vlgmr.msra.gmra.mxu0 %v972_v61  ;;  %1585 = vst [vmem:[#allocation8 + $0x10] sm:$0xff] %v972_v61  ;;  %1112 = vmatmul.f32.vlgmr.msra.gmra.mxu2 %v972_v61  ;;  %v977_v63 = vmul.f32 %v1618_v56, %v976_v60  ;;  %v1340_v59 = vld [vmem:[#allocation5 + $0x1b40] sm:$0xff]  ;;  %v1341_v60 = vld [vmem:[#allocation5 + $0x1b48] sm:$0xff] }
 0x299   :  { %1354 = vmatpush.msra.mxu0 %v1318_v36  ;;  %1394 = vmatpush.msra.mxu2 %v1319_v37  ;;  %v1304_v61 = vld [vmem:[#allocation5 + $0x1900] sm:$0xff] }
 0x29a   :  { %v978_v1 = vadd.f32 %v1618_v56, %v977_v63  ;;  %v1338_v63 = vld [vmem:[#allocation5 + $0x1b20] sm:$0xff] }
 0x29b   :  { %1355 = vmatpush.msra.mxu0 %v1316_v38  ;;  %1395 = vmatpush.msra.mxu2 %v1317_v39  ;;  %v1290_v36 = vld [vmem:[#allocation5 + $0x1820] sm:$0xff]  ;;  %v1291_v38 = vld [vmem:[#allocation5 + $0x1828] sm:$0xff] }
 0x29c   :  { %v982_v3 = vsel %vm981_vm6, %v1618_v56, %v978_v1  ;;  %v1342_v56 = vld [vmem:[#allocation5 + $0x1b60] sm:$0xff]  ;;  %v1329_v39 = vld [vmem:[#allocation5 + $0x1a88] sm:$0xff] }
 0x29d   :  { %v987_v4 = vsel %vm984_vm7, %v986_v2, %v982_v3  ;;  %1356 = vmatpush.msra.mxu0 %v1314_v40  ;;  %1396 = vmatpush.msra.mxu2 %v1315_v41  ;;  %v1302_v1 = vld [vmem:[#allocation5 + $0x18e0] sm:$0xff]  ;;  %v1303_v2 = vld [vmem:[#allocation5 + $0x18e8] sm:$0xff] }
 0x29e   :  { %1092 = vmatmul.f32.vlgmr.msra.gmra.mxu1 %v987_v4  ;;  %1586 = vst [vmem:[#allocation8 + $0x18] sm:$0xff] %v987_v4  ;;  %1132 = vmatmul.f32.vlgmr.msra.gmra.mxu3 %v987_v4  ;;  %v1770_v3 = vld [vmem:[#allocation7] sm:$0xff] }
 0x29f   :  { %1374 = vmatpush.msra.mxu1 %v1350_v42  ;;  %1414 = vmatpush.msra.mxu3 %v1351_v43  ;;  %v1054_v4 = vperm.slane %v1770_v3, 4  ;;  %v1328_v37 = vld [vmem:[#allocation5 + $0x1a80] sm:$0xff]  ;;  %v1289_v42 = vld [vmem:[#allocation5 + $0x1808] sm:$0xff] }
 0x2a0   :  { %1357 = vmatpush.msra.mxu0 %v1312_v45  ;;  %1397 = vmatpush.msra.mxu2 %v1313_v46  ;;  %v1288_v40 = vld [vmem:[#allocation5 + $0x1800] sm:$0xff]  ;;  %v1327_v43 = vld [vmem:[#allocation5 + $0x1a68] sm:$0xff] }
 0x2a1   :  { %1375 = vmatpush.msra.mxu1 %v1348_v44  ;;  %1415 = vmatpush.msra.mxu3 %v1349_v47  ;;  %v1326_v41 = vld [vmem:[#allocation5 + $0x1a60] sm:$0xff]  ;;  %v1325_v45 = vld [vmem:[#allocation5 + $0x1a48] sm:$0xff] }
 0x2a2   :  { %1358 = vmatpush.msra.mxu0 %v1310_v50  ;;  %1398 = vmatpush.msra.mxu2 %v1311_v51  ;;  %v1324_v44 = vld [vmem:[#allocation5 + $0x1a40] sm:$0xff]  ;;  %v1323_v47 = vld [vmem:[#allocation5 + $0x1a28] sm:$0xff] }
 0x2a3   :  { %1376 = vmatpush.msra.mxu1 %v1346_v48  ;;  %1416 = vmatpush.msra.mxu3 %v1347_v49  ;;  %v1322_v46 = vld [vmem:[#allocation5 + $0x1a20] sm:$0xff]  ;;  %v1321_v49 = vld [vmem:[#allocation5 + $0x1a08] sm:$0xff] }
 0x2a4   :  { %1359 = vmatpush.msra.mxu0 %v1308_v54  ;;  %1399 = vmatpush.msra.mxu2 %v1309_v55  ;;  %v1320_v48 = vld [vmem:[#allocation5 + $0x1a00] sm:$0xff]  ;;  %v1468_v51 = vld [vmem:[#allocation5 + $0x1de8] sm:$0xff] }
 0x2a5   :  { %1377 = vmatpush.msra.mxu1 %v1344_v52  ;;  %1417 = vmatpush.msra.mxu3 %v1345_v53  ;;  %v1467_v50 = vld [vmem:[#allocation5 + $0x1de0] sm:$0xff]  ;;  %v1466_v53 = vld [vmem:[#allocation5 + $0x1dc8] sm:$0xff] }
 0x2a6   :  { %1360 = vmatpush.msra.mxu0 %v1306_v58  ;;  %1400 = vmatpush.msra.mxu2 %v1307_v6  ;;  %v1465_v52 = vld [vmem:[#allocation5 + $0x1dc0] sm:$0xff]  ;;  %v1464_v55 = vld [vmem:[#allocation5 + $0x1da8] sm:$0xff] }
 0x2a7   :  { %1378 = vmatpush.msra.mxu1 %v1342_v56  ;;  %1418 = vmatpush.msra.mxu3 %v1343_v57  ;;  %v1463_v54 = vld [vmem:[#allocation5 + $0x1da0] sm:$0xff]  ;;  %v1500_v57 = vld [vmem:[#allocation5 + $0x1fe8] sm:$0xff] }
 0x2a8   :  { %1361 = vmatpush.msra.mxu0 %v1304_v61  ;;  %1401 = vmatpush.msra.mxu2 %v1305_v62  ;;  %v1499_v56 = vld [vmem:[#allocation5 + $0x1fe0] sm:$0xff]  ;;  %v1496_v62 = vld [vmem:[#allocation5 + $0x1fa8] sm:$0xff] }
 0x2a9   :  { %1379 = vmatpush.msra.mxu1 %v1340_v59  ;;  %1419 = vmatpush.msra.mxu3 %v1341_v60  ;;  %v1497_v58 = vld [vmem:[#allocation5 + $0x1fc0] sm:$0xff]  ;;  %v1462_v59 = vld [vmem:[#allocation5 + $0x1d88] sm:$0xff] }
 0x2aa   :  { %1362 = vmatpush.msra.mxu0 %v1302_v1  ;;  %1402 = vmatpush.msra.mxu2 %v1303_v2  ;;  %v1461_v6 = vld [vmem:[#allocation5 + $0x1d80] sm:$0xff]  ;;  %v1498_v60 = vld [vmem:[#allocation5 + $0x1fc8] sm:$0xff] }
 0x2ab   :  { %1380 = vmatpush.msra.mxu1 %v1338_v63  ;;  %1420 = vmatpush.msra.mxu3 %v1339_v0  ;;  %v1495_v61 = vld [vmem:[#allocation5 + $0x1fa0] sm:$0xff]  ;;  %v1460_v0 = vld [vmem:[#allocation5 + $0x1d68] sm:$0xff] }
 0x2ac   :  { %1363 = vmatpush.msra.mxu0 %v1300_v5  ;;  %1403 = vmatpush.msra.mxu2 %v1301_v7  ;;  %v1459_v63 = vld [vmem:[#allocation5 + $0x1d60] sm:$0xff]  ;;  %v1494_v2 = vld [vmem:[#allocation5 + $0x1f88] sm:$0xff] }
 0x2ad   :  { %1381 = vmatpush.msra.mxu1 %v1336_v21  ;;  %1421 = vmatpush.msra.mxu3 %v1337_v23  ;;  %v1493_v1 = vld [vmem:[#allocation5 + $0x1f80] sm:$0xff]  ;;  %v1458_v5 = vld [vmem:[#allocation5 + $0x1d48] sm:$0xff] }
 0x2ae   :  { %1364 = vmatpush.msra.mxu0 %v1298_v20  ;;  %1404 = vmatpush.msra.mxu2 %v1299_v22  ;;  %v1491_v7 = vld [vmem:[#allocation5 + $0x1f60] sm:$0xff]  ;;  %v1203_v20 = vperm.slane %v1770_v3, 5  ;;  %v1450_v22 = vld [vmem:[#allocation5 + $0x1cc8] sm:$0xff] }
 0x2af   :  { %1382 = vmatpush.msra.mxu1 %v1334_v25  ;;  %1422 = vmatpush.msra.mxu3 %v1335_v27  ;;  %v1449_v21 = vld [vmem:[#allocation5 + $0x1cc0] sm:$0xff]  ;;  %v1204_v27 = vperm.slane %v1773_v11, 5 }
 0x2b0   :  { %1365 = vmatpush.msra.mxu0 %v1296_v24  ;;  %1405 = vmatpush.msra.mxu2 %v1297_v26 }
 0x2b1   :  { %1383 = vmatpush.msra.mxu1 %v1332_v29  ;;  %1423 = vmatpush.msra.mxu3 %v1333_v31 }
 0x2b2   :  { %1366 = vmatpush.msra.mxu0 %v1294_v28  ;;  %1406 = vmatpush.msra.mxu2 %v1295_v30 }
 0x2b3   :  { %1384 = vmatpush.msra.mxu1 %v1330_v33  ;;  %1424 = vmatpush.msra.mxu3 %v1331_v35  ;;  %v1485_v35 = vld [vmem:[#allocation5 + $0x1f00] sm:$0xff] }
 0x2b4   :  { %1367 = vmatpush.msra.mxu0 %v1292_v32  ;;  %1407 = vmatpush.msra.mxu2 %v1293_v34  ;;  %v1447_v34 = vld [vmem:[#allocation5 + $0x1ca0] sm:$0xff] }
 0x2b5   :  { %1385 = vmatpush.msra.mxu1 %v1328_v37  ;;  %1425 = vmatpush.msra.mxu3 %v1329_v39  ;;  %v1486_v37 = vld [vmem:[#allocation5 + $0x1f08] sm:$0xff]  ;;  %v1483_v39 = vld [vmem:[#allocation5 + $0x1ee0] sm:$0xff] }
 0x2b6   :  { %1368 = vmatpush.msra.mxu0 %v1290_v36  ;;  %1408 = vmatpush.msra.mxu2 %v1291_v38  ;;  %v1448_v36 = vld [vmem:[#allocation5 + $0x1ca8] sm:$0xff]  ;;  %v1445_v38 = vld [vmem:[#allocation5 + $0x1c80] sm:$0xff] }
 0x2b7   :  { %1386 = vmatpush.msra.mxu1 %v1326_v41  ;;  %1426 = vmatpush.msra.mxu3 %v1327_v43  ;;  %v1484_v41 = vld [vmem:[#allocation5 + $0x1ee8] sm:$0xff]  ;;  %v1481_v43 = vld [vmem:[#allocation5 + $0x1ec0] sm:$0xff] }
 0x2b8   :  { %1369 = vmatpush.msra.mxu0 %v1288_v40  ;;  %1409 = vmatpush.msra.mxu2 %v1289_v42  ;;  %v1446_v40 = vld [vmem:[#allocation5 + $0x1c88] sm:$0xff]  ;;  %v1443_v42 = vld [vmem:[#allocation5 + $0x1c60] sm:$0xff] }
 0x2b9   :  { %1387 = vmatpush.msra.mxu1 %v1324_v44  ;;  %1427 = vmatpush.msra.mxu3 %v1325_v45  ;;  %v1444_v44 = vld [vmem:[#allocation5 + $0x1c68] sm:$0xff] }
 0x2ba   :  { %v1482_v45 = vld [vmem:[#allocation5 + $0x1ec8] sm:$0xff] }
 0x2bb   :  { %1388 = vmatpush.msra.mxu1 %v1322_v46  ;;  %1428 = vmatpush.msra.mxu3 %v1323_v47  ;;  %v1441_v46 = vld [vmem:[#allocation5 + $0x1c40] sm:$0xff] }
 0x2bc   :  { %v1479_v47 = vld [vmem:[#allocation5 + $0x1ea0] sm:$0xff] }
 0x2bd   :  { %1389 = vmatpush.msra.mxu1 %v1320_v48  ;;  %1429 = vmatpush.msra.mxu3 %v1321_v49  ;;  %v1442_v48 = vld [vmem:[#allocation5 + $0x1c48] sm:$0xff] }
 0x2be   :  { %v1480_v49 = vld [vmem:[#allocation5 + $0x1ea8] sm:$0xff] }
 0x315   :  { %v1073_v8 = vpop.f32.mrf.mxu0 }
 0x316   :  { %v1074_v14 = vadd.f32 %v1073_v8, %v1054_v4  ;;  %v1457_v4 = vld [vmem:[#allocation5 + $0x1d40] sm:$0xff]  ;;  %v1492_v8 = vld [vmem:[#allocation5 + $0x1f68] sm:$0xff] }
 0x31b   :  { %v1093_v9 = vpop.f32.mrf.mxu1  ;;  %v1113_v13 = vpop.f32.mrf.mxu2 }
 0x31c   :  { %v1094_v10 = vadd.f32 %v1093_v9, %v1074_v14  ;;  %v1114_v16 = vadd.f32 %v1113_v13, %v1055_v12  ;;  %v1455_v14 = vld [vmem:[#allocation5 + $0x1d20] sm:$0xff]  ;;  %v1456_v9 = vld [vmem:[#allocation5 + $0x1d28] sm:$0xff] }
 0x31d   :  { %v1490_v12 = vld [vmem:[#allocation5 + $0x1f48] sm:$0xff]  ;;  %v1453_v13 = vld [vmem:[#allocation5 + $0x1d00] sm:$0xff] }
 0x31e   :  { %v1136_v15 = vmax.f32 %v1094_v10, 0.0  ;;  %v1489_v10 = vld [vmem:[#allocation5 + $0x1f40] sm:$0xff] }
 0x320   :  { %1221 = vmatmul.f32.vlgmr.msrb.gmra.mxu0 %v1136_v15  ;;  %1261 = vmatmul.f32.vlgmr.msrb.gmra.mxu2 %v1136_v15  ;;  %v1454_v15 = vld [vmem:[#allocation5 + $0x1d08] sm:$0xff] }
 0x321   :  { %v1133_v17 = vpop.f32.mrf.mxu3  ;;  %1503 = vmatpush.msrb.mxu0 %v1467_v50  ;;  %1543 = vmatpush.msrb.mxu2 %v1468_v51  ;;  %v1439_v50 = vld [vmem:[#allocation5 + $0x1c20] sm:$0xff] }
 0x322   :  { %v1134_v18 = vadd.f32 %v1133_v17, %v1114_v16  ;;  %v1487_v16 = vld [vmem:[#allocation5 + $0x1f20] sm:$0xff]  ;;  %v1488_v17 = vld [vmem:[#allocation5 + $0x1f28] sm:$0xff] }
 0x323   :  { %1504 = vmatpush.msrb.mxu0 %v1465_v52  ;;  %1544 = vmatpush.msrb.mxu2 %v1466_v53  ;;  %v1477_v51 = vld [vmem:[#allocation5 + $0x1e80] sm:$0xff]  ;;  %v1440_v52 = vld [vmem:[#allocation5 + $0x1c28] sm:$0xff] }
 0x324   :  { %v1137_v19 = vmax.f32 %v1134_v18, 0.0  ;;  %v1451_v18 = vld [vmem:[#allocation5 + $0x1ce0] sm:$0xff]  ;;  %v1478_v53 = vld [vmem:[#allocation5 + $0x1e88] sm:$0xff] }
 0x325   :  { %1505 = vmatpush.msrb.mxu0 %v1463_v54  ;;  %1545 = vmatpush.msrb.mxu2 %v1464_v55  ;;  %v1437_v54 = vld [vmem:[#allocation5 + $0x1c00] sm:$0xff] }
 0x326   :  { %1241 = vmatmul.f32.vlgmr.msrb.gmra.mxu1 %v1137_v19  ;;  %1281 = vmatmul.f32.vlgmr.msrb.gmra.mxu3 %v1137_v19  ;;  %v1452_v19 = vld [vmem:[#allocation5 + $0x1ce8] sm:$0xff]  ;;  %v1475_v55 = vld [vmem:[#allocation5 + $0x1e60] sm:$0xff] }
 0x327   :  { %1523 = vmatpush.msrb.mxu1 %v1499_v56  ;;  %1563 = vmatpush.msrb.mxu3 %v1500_v57  ;;  %v1438_v56 = vld [vmem:[#allocation5 + $0x1c08] sm:$0xff] }
 0x328   :  { %1506 = vmatpush.msrb.mxu0 %v1461_v6  ;;  %1546 = vmatpush.msrb.mxu2 %v1462_v59  ;;  %v1476_v57 = vld [vmem:[#allocation5 + $0x1e68] sm:$0xff]  ;;  %v1471_v59 = vld [vmem:[#allocation5 + $0x1e20] sm:$0xff] }
 0x329   :  { %1524 = vmatpush.msrb.mxu1 %v1497_v58  ;;  %1564 = vmatpush.msrb.mxu3 %v1498_v60  ;;  %v1473_v58 = vld [vmem:[#allocation5 + $0x1e40] sm:$0xff]  ;;  %v1474_v6 = vld [vmem:[#allocation5 + $0x1e48] sm:$0xff] }
 0x32a   :  { %1507 = vmatpush.msrb.mxu0 %v1459_v63  ;;  %1547 = vmatpush.msrb.mxu2 %v1460_v0  ;;  %v1472_v60 = vld [vmem:[#allocation5 + $0x1e28] sm:$0xff]  ;;  %v1352_v63 = vperm.slane %v1770_v3, 6 }
 0x32b   :  { %1525 = vmatpush.msrb.mxu1 %v1495_v61  ;;  %1565 = vmatpush.msrb.mxu3 %v1496_v62  ;;  %v1469_v61 = vld [vmem:[#allocation5 + $0x1e00] sm:$0xff]  ;;  %v1470_v62 = vld [vmem:[#allocation5 + $0x1e08] sm:$0xff] }
 0x32c   :  { %1508 = vmatpush.msrb.mxu0 %v1457_v4  ;;  %1548 = vmatpush.msrb.mxu2 %v1458_v5  ;;  %v1353_v5 = vperm.slane %v1773_v11, 6 }
 0x32d   :  { %1526 = vmatpush.msrb.mxu1 %v1493_v1  ;;  %1566 = vmatpush.msrb.mxu3 %v1494_v2 }
 0x32e   :  { %1509 = vmatpush.msrb.mxu0 %v1455_v14  ;;  %1549 = vmatpush.msrb.mxu2 %v1456_v9 }
 0x32f   :  { %1527 = vmatpush.msrb.mxu1 %v1491_v7  ;;  %1567 = vmatpush.msrb.mxu3 %v1492_v8 }
 0x330   :  { %1510 = vmatpush.msrb.mxu0 %v1453_v13  ;;  %1550 = vmatpush.msrb.mxu2 %v1454_v15  ;;  %v1501_v13 = vperm.slane %v1770_v3, 7 }
 0x331   :  { %1528 = vmatpush.msrb.mxu1 %v1489_v10  ;;  %1568 = vmatpush.msrb.mxu3 %v1490_v12 }
 0x332   :  { %1511 = vmatpush.msrb.mxu0 %v1451_v18  ;;  %1551 = vmatpush.msrb.mxu2 %v1452_v19  ;;  %v1502_v19 = vperm.slane %v1773_v11, 7 }
 0x333   :  { %1529 = vmatpush.msrb.mxu1 %v1487_v16  ;;  %1569 = vmatpush.msrb.mxu3 %v1488_v17 }
 0x334   :  { %1512 = vmatpush.msrb.mxu0 %v1449_v21  ;;  %1552 = vmatpush.msrb.mxu2 %v1450_v22 }
 0x335   :  { %1530 = vmatpush.msrb.mxu1 %v1485_v35  ;;  %1570 = vmatpush.msrb.mxu3 %v1486_v37 }
 0x336   :  { %1513 = vmatpush.msrb.mxu0 %v1447_v34  ;;  %1553 = vmatpush.msrb.mxu2 %v1448_v36 }
 0x337   :  { %1531 = vmatpush.msrb.mxu1 %v1483_v39  ;;  %1571 = vmatpush.msrb.mxu3 %v1484_v41 }
 0x338   :  { %1514 = vmatpush.msrb.mxu0 %v1445_v38  ;;  %1554 = vmatpush.msrb.mxu2 %v1446_v40 }
 0x339   :  { %1532 = vmatpush.msrb.mxu1 %v1481_v43  ;;  %1572 = vmatpush.msrb.mxu3 %v1482_v45 }
 0x33a   :  { %1515 = vmatpush.msrb.mxu0 %v1443_v42  ;;  %1555 = vmatpush.msrb.mxu2 %v1444_v44 }
 0x33b   :  { %1533 = vmatpush.msrb.mxu1 %v1479_v47  ;;  %1573 = vmatpush.msrb.mxu3 %v1480_v49 }
 0x33c   :  { %1516 = vmatpush.msrb.mxu0 %v1441_v46  ;;  %1556 = vmatpush.msrb.mxu2 %v1442_v48 }
 0x33d   :  { %1534 = vmatpush.msrb.mxu1 %v1477_v51  ;;  %1574 = vmatpush.msrb.mxu3 %v1478_v53 }
 0x33e   :  { %1517 = vmatpush.msrb.mxu0 %v1439_v50  ;;  %1557 = vmatpush.msrb.mxu2 %v1440_v52 }
 0x33f   :  { %1535 = vmatpush.msrb.mxu1 %v1475_v55  ;;  %1575 = vmatpush.msrb.mxu3 %v1476_v57 }
 0x340   :  { %1518 = vmatpush.msrb.mxu0 %v1437_v54  ;;  %1558 = vmatpush.msrb.mxu2 %v1438_v56 }
 0x341   :  { %1536 = vmatpush.msrb.mxu1 %v1473_v58  ;;  %1576 = vmatpush.msrb.mxu3 %v1474_v6 }
 0x343   :  { %1537 = vmatpush.msrb.mxu1 %v1471_v59  ;;  %1577 = vmatpush.msrb.mxu3 %v1472_v60 }
 0x345   :  { %1538 = vmatpush.msrb.mxu1 %v1469_v61  ;;  %1578 = vmatpush.msrb.mxu3 %v1470_v62 }
 0x39d   :  { %v1222_v23 = vpop.f32.mrf.mxu0 }
 0x39e   :  { %v1223_v24 = vadd.f32 %v1222_v23, %v1203_v20 }
 0x3a3   :  { %v1242_v25 = vpop.f32.mrf.mxu1  ;;  %v1262_v28 = vpop.f32.mrf.mxu2 }
 0x3a4   :  { %v1243_v26 = vadd.f32 %v1242_v25, %v1223_v24  ;;  %v1263_v30 = vadd.f32 %v1262_v28, %v1204_v27 }
 0x3a6   :  { %v1285_v29 = vmax.f32 %v1243_v26, 0.0 }
 0x3a8   :  { %1370 = vmatmul.f32.vlgmr.msra.gmra.mxu0 %v1285_v29  ;;  %1410 = vmatmul.f32.vlgmr.msra.gmra.mxu2 %v1285_v29 }
 0x3a9   :  { %v1282_v31 = vpop.f32.mrf.mxu3 }
 0x3aa   :  { %v1283_v32 = vadd.f32 %v1282_v31, %v1263_v30 }
 0x3ac   :  { %v1286_v33 = vmax.f32 %v1283_v32, 0.0 }
 0x3ae   :  { %1390 = vmatmul.f32.vlgmr.msra.gmra.mxu1 %v1286_v33  ;;  %1430 = vmatmul.f32.vlgmr.msra.gmra.mxu3 %v1286_v33 }
 0x425   :  { %v1371_v0 = vpop.f32.mrf.mxu0 }
 0x426   :  { %v1372_v1 = vadd.f32 %v1371_v0, %v1352_v63 }
 0x42b   :  { %v1391_v2 = vpop.f32.mrf.mxu1  ;;  %v1411_v7 = vpop.f32.mrf.mxu2 }
 0x42c   :  { %v1392_v4 = vadd.f32 %v1391_v2, %v1372_v1  ;;  %v1412_v14 = vadd.f32 %v1411_v7, %v1353_v5 }
 0x42e   :  { %v1434_v8 = vmax.f32 %v1392_v4, 0.0 }
 0x430   :  { %1519 = vmatmul.f32.vlgmr.msrb.gmra.mxu0 %v1434_v8  ;;  %1559 = vmatmul.f32.vlgmr.msrb.gmra.mxu2 %v1434_v8 }
 0x431   :  { %v1431_v9 = vpop.f32.mrf.mxu3 }
 0x432   :  { %v1432_v10 = vadd.f32 %v1431_v9, %v1412_v14 }
 0x434   :  { %v1435_v12 = vmax.f32 %v1432_v10, 0.0 }
 0x436   :  { %1539 = vmatmul.f32.vlgmr.msrb.gmra.mxu1 %v1435_v12  ;;  %1579 = vmatmul.f32.vlgmr.msrb.gmra.mxu3 %v1435_v12 }
 0x4ad   :  { %v1520_v15 = vpop.f32.mrf.mxu0 }
 0x4ae   :  { %v1521_v16 = vadd.f32 %v1520_v15, %v1501_v13 }
 0x4b3   :  { %v1540_v17 = vpop.f32.mrf.mxu1  ;;  %v1560_v20 = vpop.f32.mrf.mxu2 }
 0x4b4   :  { %v1541_v18 = vadd.f32 %v1540_v17, %v1521_v16  ;;  %v1561_v21 = vadd.f32 %v1560_v20, %v1502_v19 }
 0x4b6   :  { %1583 = vst [vmem:[#allocation8] sm:$0xff] %v1541_v18 }
 0x4b9   :  { %v1580_v22 = vpop.f32.mrf.mxu3 }
 0x4ba   :  { %v1581_v23 = vadd.f32 %v1580_v22, %v1561_v21 }
 0x4bc   :  { %1584 = vst [vmem:[#allocation8 + $0x8] sm:$0xff] %v1581_v23 }
 0x4bd   :  { %1597 = dma.vmem_to_hbm [thread:$0]  %s1593_s2, 512, %s1595_s30, [#allocation4]  }
 0x4be   :  { %1721 = dma.done.wait [#allocation4], 512  }
 0x4bf   :  { %1722 = vsyncadd [#allocation4], 4294966784 }
 0x4c0   :  { %1602 = vsyncpa [#allocation3], 1 }
 0x4c1   :  { %1603 = vsyncpa [#allocation6], 1 }
 0x4c2   :  { %1604 = vsyncpa [#allocation4], 1 }

</bundles_post_ra>
